<compile_context>
chip_gen: v6e
topology: v6e:2x2x1
jax: 0.10.0
libtpu: 0.0.40
codegen_flags: <defaults>
</compile_context>

<pallas_src>
import math

import jax
import jax.numpy as jnp
import numpy as np
from jax.experimental import pallas as pl
from jax.experimental.pallas import tpu as pltpu


# ----------------------------- configuration ------------------------------ #
NODE_DIM = 32
NUM_BASIS = 16
# node_irreps = "8x0e + 8x1o + 4x2e"
IRREPS = [(8, 0), (8, 1), (4, 2)]                       # (multiplicity, l)
NUM_IRREPS = sum(mul for mul, _ in IRREPS)              # 20
D_IRREPS = sum(mul * (2 * l + 1) for mul, l in IRREPS)  # 52

NODE_CHUNK = 1024   # chunk the node axis of the one-hot gather above this


def _round_up(x, m):
    return (x + m - 1) // m * m


def _silu(x):
    return x * jax.nn.sigmoid(x)


# ------------------------------- Pallas kernel ----------------------------- #
def _make_equifilter_kernel(node_chunk):
    def kernel(idx_ref, rbf_ref, xequi_ref,
               w1a_ref, w1b_ref, b1_ref, w2_ref, b2_ref,
               out_ref):
        n_nodes = xequi_ref.shape[0]

        idx = idx_ref[...]                               # (TE, 2) int32
        ctr = idx[:, 0:1]
        nbr = idx[:, 1:2]

        # Fused gather + subtract on the MXU:
        #   x_ij = (onehot(neighbor) - onehot(center)) @ x_equi
        # oh_diff is exactly +-1/0 so building it in bf16 is lossless; x_equi
        # is bf16 (intentional mixed precision), accumulation is f32.
        def gather(c0, width):
            node_ids = c0 + jax.lax.broadcasted_iota(jnp.int32, (1, width), 1)
            oh = ((nbr == node_ids).astype(jnp.bfloat16)
                  - (ctr == node_ids).astype(jnp.bfloat16))        # (TE, width)
            return jnp.dot(oh, xequi_ref[pl.ds(c0, width), :],
                           preferred_element_type=jnp.float32)     # (TE, D) f32

        if n_nodes <= node_chunk:
            x_ij = gather(0, n_nodes)
        else:
            # n_nodes is padded to a multiple of node_chunk in the wrapper;
            # chunking caps the (TE, n_nodes) one-hot intermediate.
            x_ij = gather(0, node_chunk)
            for c in range(1, n_nodes // node_chunk):
                x_ij = x_ij + gather(c * node_chunk, node_chunk)

        # EquivariantDot folded into layer 1: (x_ij*x_ij) @ (sel @ w1i).
        # Square in f32 (precision), feed the MXU in bf16, accumulate in f32.
        sq = (x_ij * x_ij).astype(jnp.bfloat16)                    # (TE, D_IRREPS)

        # Fused layer 1 of both MLPs via zero block-column weights:
        #   cols [0:node_dim)          = invariant branch pre-activation
        #   cols [node_dim:2*node_dim) = rbf branch pre-activation
        z = (jnp.dot(sq, w1a_ref[...], preferred_element_type=jnp.float32)
             + jnp.dot(rbf_ref[...], w1b_ref[...], preferred_element_type=jnp.float32)
             + b1_ref[...])                                        # (TE, 2*node_dim) f32
        hg = (z * jax.nn.sigmoid(z)).astype(jnp.bfloat16)          # SiLU in f32

        # Fused layer 2: [h | g] @ vstack(w2_inv, w2_rbf) + (b2_inv + b2_rbf)
        # == w_ij_l + w_ij_r.
        out = jnp.dot(hg, w2_ref[...], preferred_element_type=jnp.float32) + b2_ref[...]
        out_ref[...] = out.astype(out_ref.dtype)

    return kernel


def equifilter_forward(x_equi, rbf, center_idx, neighbor_idx, fused,
                       tile_e=4096, out_dtype=jnp.float32):
    E = rbf.shape[0]
    n_nodes, d_irreps = x_equi.shape
    num_basis = rbf.shape[1]
    node_dim = fused["w2"].shape[1]

    # --- edge tiling: big tiles (amortize the ~0.35us/step overhead), multiples
    # of 256 (MXU/DMA cadence), and cap so the grid has >=2 steps whenever E
    # allows, so the "parallel" edge axis shards across v7x's 2 TensorCores.
    tile_e = max(256, _round_up(tile_e, 256))
    tile_e = min(tile_e, max(256, _round_up(pl.cdiv(E, 2), 256)))
    e_pad = _round_up(E, tile_e)
    grid = (e_pad // tile_e,)

    idx = jnp.stack([center_idx.astype(jnp.int32),
                     neighbor_idx.astype(jnp.int32)], axis=-1)     # (E, 2)
    rbf_bf = rbf.astype(jnp.bfloat16)
    if e_pad != E:
        pad = e_pad - E
        idx = jnp.pad(idx, ((0, pad), (0, 0)))      # padded edges: node0 - node0 = 0
        rbf_bf = jnp.pad(rbf_bf, ((0, pad), (0, 0)))

    # bf16 resident copy of x_equi (only the gather matmul consumes it).
    # Pad the node axis only when chunking kicks in; padded nodes never match
    # any index so they contribute zeros.
    n_nodes_pad = n_nodes if n_nodes <= NODE_CHUNK else _round_up(n_nodes, NODE_CHUNK)
    xequi_bf = x_equi.astype(jnp.bfloat16)
    if n_nodes_pad != n_nodes:
        xequi_bf = jnp.pad(xequi_bf, ((0, n_nodes_pad - n_nodes), (0, 0)))

    # Grid-invariant blocks (constant index map) are DMA'd once and stay
    # VMEM-resident across the whole grid.
    full = lambda shape: pl.BlockSpec(shape, lambda i: (0, 0))

    out_itemsize = jnp.dtype(out_dtype).itemsize
    flops = 2 * e_pad * (n_nodes_pad * d_irreps
                         + d_irreps * 2 * node_dim
                         + num_basis * 2 * node_dim
                         + 2 * node_dim * node_dim)
    bytes_accessed = (e_pad * (2 * 4 + num_basis * 2 + node_dim * out_itemsize)
                      + n_nodes_pad * d_irreps * 2
                      + (d_irreps + num_basis) * 2 * node_dim * 2
                      + 2 * node_dim * node_dim * 2
                      + 3 * node_dim * 4)
    cost = pl.CostEstimate(flops=flops,
                           transcendentals=e_pad * 2 * node_dim,
                           bytes_accessed=bytes_accessed)

    # Explicit scoped-VMEM budget (v5e default is only 16 MiB): double-buffered
    # edge tiles + resident weights/x_equi + in-kernel intermediates + headroom,
    # capped below v7x's 64 MiB physical VMEM.
    step_bytes = tile_e * (2 * 4 + num_basis * 2 + node_dim * out_itemsize)
    resident_bytes = (n_nodes_pad * d_irreps * 2
                      + (d_irreps + num_basis) * 2 * node_dim * 2
                      + 2 * node_dim * node_dim * 2
                      + 3 * node_dim * 4)
    interm_bytes = tile_e * (min(n_nodes_pad, NODE_CHUNK) * 2      # oh_diff chunk (bf16)
                             + d_irreps * 6                        # x_ij f32 + sq bf16
                             + 2 * node_dim * 6                    # z f32 + hg bf16
                             + node_dim * 4)                       # pre-cast output
    vmem_limit = int(min(max(2 * step_bytes + resident_bytes + interm_bytes + (8 << 20),
                             32 << 20),
                         56 << 20))

    out = pl.pallas_call(
        _make_equifilter_kernel(NODE_CHUNK),
        out_shape=jax.ShapeDtypeStruct((e_pad, node_dim), out_dtype),
        grid_spec=pltpu.PrefetchScalarGridSpec(
            num_scalar_prefetch=0,
            grid=grid,
            in_specs=[
                pl.BlockSpec((tile_e, 2), lambda i: (i, 0)),          # [center|neighbor] idx
                pl.BlockSpec((tile_e, num_basis), lambda i: (i, 0)),  # rbf (bf16)
                full((n_nodes_pad, d_irreps)),                        # x_equi (resident, bf16)
                full((d_irreps, 2 * node_dim)),                       # [sel@w1i | 0]   bf16
                full((num_basis, 2 * node_dim)),                      # [0 | w1r]       bf16
                full((1, 2 * node_dim)),                              # [b1i | b1r]     f32
                full((2 * node_dim, node_dim)),                       # vstack(w2i,w2r) bf16
                full((1, node_dim)),                                  # b2i + b2r       f32
            ],
            out_specs=pl.BlockSpec((tile_e, node_dim), lambda i: (i, 0)),
        ),
        compiler_params=pltpu.CompilerParams(
            dimension_semantics=("parallel",),
            vmem_limit_bytes=vmem_limit),
        cost_estimate=cost,
    )(idx, rbf_bf, xequi_bf,
      fused["w1a"], fused["w1b"], fused["b1"], fused["w2"], fused["b2"])

    return out[:E]


# ----------------------------- parameter setup ----------------------------- #
def make_selection_matrix():
    """S[d, k] = 1/sqrt(2l+1) if component d belongs to irrep instance k."""
    sel = np.zeros((D_IRREPS, NUM_IRREPS), dtype=np.float32)
    d = 0
    k = 0
    for mul, l in IRREPS:
        dim = 2 * l + 1
        scale = 1.0 / math.sqrt(dim)
        for _ in range(mul):
            sel[d:d + dim, k] = scale
            d += dim
            k += 1
    return jnp.asarray(sel)


def init_linear(key, fan_in, fan_out):
    """Deterministic PyTorch-style nn.Linear init; weight stored [in, out]."""
    kw, kb = jax.random.split(key)
    bound = 1.0 / math.sqrt(fan_in)
    w = jax.random.uniform(kw, (fan_in, fan_out), jnp.float32, -bound, bound)
    b = jax.random.uniform(kb, (1, fan_out), jnp.float32, -bound, bound)
    return w, b


def init_params(key):
    k = jax.random.split(key, 4)
    w1i, b1i = init_linear(k[0], NUM_IRREPS, NODE_DIM)
    w2i, b2i = init_linear(k[1], NODE_DIM, NODE_DIM)
    w1r, b1r = init_linear(k[2], NUM_BASIS, NODE_DIM)
    w2r, b2r = init_linear(k[3], NODE_DIM, NODE_DIM)
    return dict(w1i=w1i, b1i=b1i, w2i=w2i, b2i=b2i,
                w1r=w1r, b1r=b1r, w2r=w2r, b2r=b2r)


def fuse_params(params, sel):
    """Host-side weight fusion: fold sel into w1i and block-fuse the two MLPs."""
    w1i_fold = sel @ params["w1i"]                                   # (D_IRREPS, node_dim)
    w1a = jnp.concatenate([w1i_fold, jnp.zeros_like(w1i_fold)], axis=1)
    w1b = jnp.concatenate([jnp.zeros_like(params["w1r"]), params["w1r"]], axis=1)
    b1 = jnp.concatenate([params["b1i"], params["b1r"]], axis=1)
    w2 = jnp.concatenate([params["w2i"], params["w2r"]], axis=0)
    b2 = params["b2i"] + params["b2r"]
    return dict(w1a=w1a.astype(jnp.bfloat16),
                w1b=w1b.astype(jnp.bfloat16),
                b1=b1.astype(jnp.float32),
                w2=w2.astype(jnp.bfloat16),
                b2=b2.astype(jnp.float32))


# ------------------------------ pure-JAX reference ------------------------- #
def reference_forward(x_equi, rbf, center_idx, neighbor_idx, params, sel):
    x_ij = x_equi[neighbor_idx] - x_equi[center_idx]
    inv = (x_ij * x_ij) @ sel
    h = _silu(inv @ params["w1i"] + params["b1i"])
    w_l = h @ params["w2i"] + params["b2i"]
    g = _silu(rbf @ params["w1r"] + params["b1r"])
    w_r = g @ params["w2r"] + params["b2r"]
    return w_l + w_r


# ----------------------------------- main ----------------------------------- #
if __name__ == "__main__":
    key = jax.random.PRNGKey(0)
    k_x, k_rbf, k_ci, k_ni, k_p = jax.random.split(key, 5)

    N_NODES = 8
    N_EDGES = 300          # NOT a multiple of the tile: exercises pad-and-mask

    x_equi = jax.random.normal(k_x, (N_NODES, D_IRREPS), jnp.float32)
    rbf = jax.random.normal(k_rbf, (N_EDGES, NUM_BASIS), jnp.float32)
    center_idx = jax.random.randint(k_ci, (N_EDGES,), 0, N_NODES, jnp.int32)
    neighbor_idx = jax.random.randint(k_ni, (N_EDGES,), 0, N_NODES, jnp.int32)

    params = init_params(k_p)
    sel = make_selection_matrix()
    fused = fuse_params(params, sel)

    # With 300 edges the v7x 2-step heuristic clamps the tile to 256, giving a
    # 2-step grid (512 padded rows) that exercises pad-and-mask and pipelining.
    out = equifilter_forward(x_equi, rbf, center_idx, neighbor_idx, fused)
    out = jax.block_until_ready(out)

    ref = reference_forward(x_equi, rbf, center_idx, neighbor_idx, params, sel)
    # Intentional mixed precision (bf16 gather/weights/activations, f32
    # accumulation); 3e-2 tolerance covers the resulting ~0.5% per-matmul error.
    np.testing.assert_allclose(np.asarray(out), np.asarray(ref),
                               rtol=3e-2, atol=3e-2)

    print("KERNEL_OK")
</pallas_src>

<mosaic_0001>
module attributes {stable_mosaic.version = 11 : i64} {
  func.func @kernel(%arg0: i32, %arg1: memref<256x2xi32, #tpu.memory_space<vmem>>, %arg2: memref<256x16xbf16, #tpu.memory_space<vmem>>, %arg3: memref<8x52xbf16, #tpu.memory_space<vmem>>, %arg4: memref<52x64xbf16, #tpu.memory_space<vmem>>, %arg5: memref<16x64xbf16, #tpu.memory_space<vmem>>, %arg6: memref<1x64xf32, #tpu.memory_space<vmem>>, %arg7: memref<64x32xbf16, #tpu.memory_space<vmem>>, %arg8: memref<1x32xf32, #tpu.memory_space<vmem>>, %arg9: memref<256x32xf32, #tpu.memory_space<vmem>>) attributes {dimension_semantics = [#tpu.dimension_semantics<parallel>], iteration_bounds = array<i64: 2>, scalar_prefetch = 0 : i64, scratch_operands = 0 : i64, tpu.core_type = #tpu.core_type<tc>, window_params = [{transform_indices = @transform_0, window_bounds = array<i64: 256, 2>}, {transform_indices = @transform_1, window_bounds = array<i64: 256, 16>}, {pipeline_mode = #tpu.pipeline_mode<synchronous>, transform_indices = @transform_2, window_bounds = array<i64: 8, 52>}, {pipeline_mode = #tpu.pipeline_mode<synchronous>, transform_indices = @transform_3, window_bounds = array<i64: 52, 64>}, {pipeline_mode = #tpu.pipeline_mode<synchronous>, transform_indices = @transform_4, window_bounds = array<i64: 16, 64>}, {pipeline_mode = #tpu.pipeline_mode<synchronous>, transform_indices = @transform_5, window_bounds = array<i64: 1, 64>}, {pipeline_mode = #tpu.pipeline_mode<synchronous>, transform_indices = @transform_6, window_bounds = array<i64: 64, 32>}, {pipeline_mode = #tpu.pipeline_mode<synchronous>, transform_indices = @transform_7, window_bounds = array<i64: 1, 32>}, {transform_indices = @transform_8, window_bounds = array<i64: 256, 32>}]} {
    %c0 = arith.constant 0 : index
    %c0_0 = arith.constant 0 : index
    %0 = vector.load %arg1[%c0, %c0_0] : memref<256x2xi32, #tpu.memory_space<vmem>>, vector<256x2xi32>
    %1 = vector.extract_strided_slice %0 {offsets = [0, 0], sizes = [256, 1], strides = [1, 1]} : vector<256x2xi32> to vector<256x1xi32>
    %2 = vector.extract_strided_slice %0 {offsets = [0, 1], sizes = [256, 1], strides = [1, 1]} : vector<256x2xi32> to vector<256x1xi32>
    %3 = tpu.iota {dimensions = array<i32: 1>} : vector<1x8xi32>
    %c0_i32 = arith.constant 0 : i32
    %4 = vector.broadcast %c0_i32 : i32 to vector<1x8xi32>
    %5 = arith.addi %4, %3 : vector<1x8xi32>
    %6 = vector.broadcast %2 : vector<256x1xi32> to vector<256x8xi32>
    %7 = vector.broadcast %5 : vector<1x8xi32> to vector<256x8xi32>
    %8 = arith.cmpi eq, %6, %7 : vector<256x8xi32>
    %9 = arith.extui %8 : vector<256x8xi1> to vector<256x8xi32>
    %10 = arith.sitofp %9 : vector<256x8xi32> to vector<256x8xf32>
    %11 = arith.truncf %10 : vector<256x8xf32> to vector<256x8xbf16>
    %12 = vector.broadcast %1 : vector<256x1xi32> to vector<256x8xi32>
    %13 = vector.broadcast %5 : vector<1x8xi32> to vector<256x8xi32>
    %14 = arith.cmpi eq, %12, %13 : vector<256x8xi32>
    %15 = arith.extui %14 : vector<256x8xi1> to vector<256x8xi32>
    %16 = arith.sitofp %15 : vector<256x8xi32> to vector<256x8xf32>
    %17 = arith.truncf %16 : vector<256x8xf32> to vector<256x8xbf16>
    %18 = arith.subf %11, %17 : vector<256x8xbf16>
    %c0_1 = arith.constant 0 : index
    %c0_2 = arith.constant 0 : index
    %19 = vector.load %arg3[%c0_1, %c0_2] : memref<8x52xbf16, #tpu.memory_space<vmem>>, vector<8x52xbf16>
    %cst = arith.constant dense<0.000000e+00> : vector<256x52xf32>
    %20 = tpu.matmul %18, %19, %cst {dimension_numbers = #tpu.dot_dimension_numbers<[1], [0], [0], [1], [0, 0, 1, 1], [], []>} : vector<256x8xbf16>, vector<8x52xbf16>, vector<256x52xf32> -> vector<256x52xf32>
    %21 = arith.mulf %20, %20 : vector<256x52xf32>
    %22 = arith.truncf %21 : vector<256x52xf32> to vector<256x52xbf16>
    %c0_3 = arith.constant 0 : index
    %c0_4 = arith.constant 0 : index
    %23 = vector.load %arg4[%c0_3, %c0_4] : memref<52x64xbf16, #tpu.memory_space<vmem>>, vector<52x64xbf16>
    %cst_5 = arith.constant dense<0.000000e+00> : vector<256x64xf32>
    %24 = tpu.matmul %22, %23, %cst_5 {dimension_numbers = #tpu.dot_dimension_numbers<[1], [0], [0], [1], [0, 0, 1, 1], [], []>} : vector<256x52xbf16>, vector<52x64xbf16>, vector<256x64xf32> -> vector<256x64xf32>
    %c0_6 = arith.constant 0 : index
    %c0_7 = arith.constant 0 : index
    %25 = vector.load %arg2[%c0_6, %c0_7] : memref<256x16xbf16, #tpu.memory_space<vmem>>, vector<256x16xbf16>
    %c0_8 = arith.constant 0 : index
    %c0_9 = arith.constant 0 : index
    %26 = vector.load %arg5[%c0_8, %c0_9] : memref<16x64xbf16, #tpu.memory_space<vmem>>, vector<16x64xbf16>
    %cst_10 = arith.constant dense<0.000000e+00> : vector<256x64xf32>
    %27 = tpu.matmul %25, %26, %cst_10 {dimension_numbers = #tpu.dot_dimension_numbers<[1], [0], [0], [1], [0, 0, 1, 1], [], []>} : vector<256x16xbf16>, vector<16x64xbf16>, vector<256x64xf32> -> vector<256x64xf32>
    %28 = arith.addf %24, %27 : vector<256x64xf32>
    %c0_11 = arith.constant 0 : index
    %c0_12 = arith.constant 0 : index
    %29 = vector.load %arg6[%c0_11, %c0_12] : memref<1x64xf32, #tpu.memory_space<vmem>>, vector<1x64xf32>
    %30 = vector.broadcast %29 : vector<1x64xf32> to vector<256x64xf32>
    %31 = arith.addf %28, %30 : vector<256x64xf32>
    %32 = arith.negf %31 : vector<256x64xf32>
    %33 = math.exp %32 : vector<256x64xf32>
    %cst_13 = arith.constant 1.000000e+00 : f32
    %34 = vector.broadcast %cst_13 : f32 to vector<256x64xf32>
    %35 = arith.addf %34, %33 : vector<256x64xf32>
    %36 = arith.divf %34, %35 : vector<256x64xf32>
    %37 = arith.mulf %31, %36 : vector<256x64xf32>
    %38 = arith.truncf %37 : vector<256x64xf32> to vector<256x64xbf16>
    %c0_14 = arith.constant 0 : index
    %c0_15 = arith.constant 0 : index
    %39 = vector.load %arg7[%c0_14, %c0_15] : memref<64x32xbf16, #tpu.memory_space<vmem>>, vector<64x32xbf16>
    %cst_16 = arith.constant dense<0.000000e+00> : vector<256x32xf32>
    %40 = tpu.matmul %38, %39, %cst_16 {dimension_numbers = #tpu.dot_dimension_numbers<[1], [0], [0], [1], [0, 0, 1, 1], [], []>} : vector<256x64xbf16>, vector<64x32xbf16>, vector<256x32xf32> -> vector<256x32xf32>
    %c0_17 = arith.constant 0 : index
    %c0_18 = arith.constant 0 : index
    %41 = vector.load %arg8[%c0_17, %c0_18] : memref<1x32xf32, #tpu.memory_space<vmem>>, vector<1x32xf32>
    %42 = vector.broadcast %41 : vector<1x32xf32> to vector<256x32xf32>
    %43 = arith.addf %40, %42 : vector<256x32xf32>
    %c0_19 = arith.constant 0 : index
    %c0_20 = arith.constant 0 : index
    %44 = vector.load %arg9[%c0_19, %c0_20] : memref<256x32xf32, #tpu.memory_space<vmem>>, vector<256x32xf32>
    tpu.vector_store %arg9[%c0_19, %c0_20], %43 {strides = array<i32>} : memref<256x32xf32, #tpu.memory_space<vmem>>, vector<256x32xf32>,
    return
  }
  func.func @transform_0(%arg0: i32) -> (i32, i32) {
    %c0_i32 = arith.constant 0 : i32
    %c0_i32_0 = arith.constant 0 : i32
    return %arg0, %c0_i32 : i32, i32
  }
  func.func @transform_1(%arg0: i32) -> (i32, i32) {
    %c0_i32 = arith.constant 0 : i32
    %c0_i32_0 = arith.constant 0 : i32
    return %arg0, %c0_i32 : i32, i32
  }
  func.func @transform_2(%arg0: i32) -> (i32, i32) {
    %c0_i32 = arith.constant 0 : i32
    %c0_i32_0 = arith.constant 0 : i32
    %c0_i32_1 = arith.constant 0 : i32
    return %c0_i32, %c0_i32_0 : i32, i32
  }
  func.func @transform_3(%arg0: i32) -> (i32, i32) {
    %c0_i32 = arith.constant 0 : i32
    %c0_i32_0 = arith.constant 0 : i32
    %c0_i32_1 = arith.constant 0 : i32
    return %c0_i32, %c0_i32_0 : i32, i32
  }
  func.func @transform_4(%arg0: i32) -> (i32, i32) {
    %c0_i32 = arith.constant 0 : i32
    %c0_i32_0 = arith.constant 0 : i32
    %c0_i32_1 = arith.constant 0 : i32
    return %c0_i32, %c0_i32_0 : i32, i32
  }
  func.func @transform_5(%arg0: i32) -> (i32, i32) {
    %c0_i32 = arith.constant 0 : i32
    %c0_i32_0 = arith.constant 0 : i32
    %c0_i32_1 = arith.constant 0 : i32
    return %c0_i32, %c0_i32_0 : i32, i32
  }
  func.func @transform_6(%arg0: i32) -> (i32, i32) {
    %c0_i32 = arith.constant 0 : i32
    %c0_i32_0 = arith.constant 0 : i32
    %c0_i32_1 = arith.constant 0 : i32
    return %c0_i32, %c0_i32_0 : i32, i32
  }
  func.func @transform_7(%arg0: i32) -> (i32, i32) {
    %c0_i32 = arith.constant 0 : i32
    %c0_i32_0 = arith.constant 0 : i32
    %c0_i32_1 = arith.constant 0 : i32
    return %c0_i32, %c0_i32_0 : i32, i32
  }
  func.func @transform_8(%arg0: i32) -> (i32, i32) {
    %c0_i32 = arith.constant 0 : i32
    %c0_i32_0 = arith.constant 0 : i32
    return %arg0, %c0_i32 : i32, i32
  }
}

</mosaic_0001>

<bundles_post_ra>
// kernel: tpu_custom_call.1
= control target key start
LH: loop header
LB: loop body
LE: loop exit
PB: predicated region body
PF: predicated region fallthrough
CT: control target
= control target key end

     0   :  { %s2940_s27 = smov 0   ;;  %s3524_s0 = inlined_call_operand.vmem [shape: s32[512,2], index: 0, kind: input, shape index: {}]   ;;  %s3525_s1 = inlined_call_operand.vmem [shape: bf16[512,16], index: 1, kind: input, shape index: {}]   ;;  %s3526_s2 = inlined_call_operand.vmem [shape: bf16[8,52], index: 2, kind: input, shape index: {}]   ;;  %s3527_s3 = inlined_call_operand.vmem [shape: bf16[52,64], index: 3, kind: input, shape index: {}]   ;;  %s3528_s4 = inlined_call_operand.vmem [shape: bf16[16,64], index: 4, kind: input, shape index: {}]   ;;  %s3529_s5 = inlined_call_operand.vmem [shape: f32[1,64], index: 5, kind: input, shape index: {}]   ;;  %s3530_s6 = inlined_call_operand.vmem [shape: bf16[64,32], index: 6, kind: input, shape index: {}]   ;;  %s3531_s7 = inlined_call_operand.vmem [shape: f32[1,32], index: 7, kind: input, shape index: {}]   ;;  %s3532_s8 = inlined_call_operand.vmem [shape: f32[512,32], index: 8, kind: output, shape index: {}]  }
   0x1 LB: > { %s2262_s28 = sadd.s32 4294967295, %s2890_s27   ;;  %p2266_p0 = scmp.ge.s32.totalorder %s2890_s27, 1  ;;  %s2890_s27 = sphi %s2940_s27, %s18_s27  }
   0x2   : > { %p274_p1 = scmp.lt.s32.totalorder %s2890_s27, 3 }
   0x4   : > { %p275_p2 = pnand %p2266_p0, %p274_p1 }
   0x5   : > { %s2267_s29 = sshll.u32 (!%p275_p2), %s2262_s28, 5 }
   0x6   : > { %278 = sbr.rel (%p275_p2) target bundleno = 973 (0x3cd), region = 52  ;;  %p314_p3 = scmp.lt.s32.totalorder (!%p275_p2), %s2267_s29, 63 }
   0xb   : > { %v2892_v0 = vmov 0   ;;  %s3534_s29 = smov (!%p314_p3, %s2267_s29), 63  ;;  %v2893_v7 = vmov 1   ;;  %v798_v15 = vld [vmem:[%s3526_s2] sm:$0xf]  ;;  %vm848_vm0 = vcmask 1043456   ;;  %v364_v44 = vlaneseq }
   0xc   : > { %2699 = vset.pattern.permute.xlu0 %v2892_v0  ;;  %2697 = vset.pattern.permute.xlu1 %v2892_v0  ;;  %s2268_s30 = sshll.u32 %s3534_s29, 3  ;;  %v850_v16 = vsel %vm848_vm0, %v798_v15, 0  ;;  %v2894_v51 = vmov 0.0   ;;  %vm799_vm8 = vcmask 64512   ;;  %s2270_s24 = sshll.u32 %s3534_s29, 2 }
   0xd   : > { %s2958_s11 = scalar_lea.vmem %s3524_s0, %s2268_s30  ;;  %2684 = vmatprep.subr.msk.bf16.mxu0 %vm848_vm0, %v798_v15  ;;  %v3034_v48 = vand.u32 127, %v364_v44  ;;  %s3157_s28 = scalar_lea.vmem %s3525_s1, %s2270_s24 }
   0xe   : > { %v334_v1 = vld [vmem:[%s2958_s11 + $0x10] sm:$0xff]  ;;  %v332_v2 = vld [vmem:[%s2958_s11] sm:$0xff]  ;;  %v333_v4 = vld [vmem:[%s2958_s11 + $0x8] sm:$0xff]  ;;  %2537 = vmatpush3.bf16.msra.mxu0 %v850_v16  ;;  %s3423_s23 = scalar_lea.vmem %s3532_s8, %s2268_s30 }
   0xf   : > { %581 = vperm.xlu0 %2699, %v334_v1   ;;  %575 = vperm.xlu1 %2697, %v332_v2   ;;  %v338_v3 = vld [vmem:[%s2958_s11 + $0x30] sm:$0xff]  ;;  %v335_v6 = vld [vmem:[%s2958_s11 + $0x18] sm:$0xff]  ;;  %v336_v10 = vld [vmem:[%s2958_s11 + $0x20] sm:$0xff] }
  0x10   : > { %v342_v5 = vld [vmem:[%s2958_s11 + $0x50] sm:$0xff]  ;;  %v337_v13 = vld [vmem:[%s2958_s11 + $0x28] sm:$0xff]  ;;  %v339_v14 = vld [vmem:[%s2958_s11 + $0x38] sm:$0xff] }
  0x11   : > { %v346_v8 = vld [vmem:[%s2958_s11 + $0x70] sm:$0xff]  ;;  %v340_v17 = vld [vmem:[%s2958_s11 + $0x40] sm:$0xff]  ;;  %v341_v18 = vld [vmem:[%s2958_s11 + $0x48] sm:$0xff] }
  0x12   : > { %v350_v9 = vld [vmem:[%s2958_s11 + $0x90] sm:$0xff]  ;;  %v343_v19 = vld [vmem:[%s2958_s11 + $0x58] sm:$0xff]  ;;  %v345_v20 = vld [vmem:[%s2958_s11 + $0x68] sm:$0xff] }
  0x13   : > { %593 = vperm.xlu0 %2699, %v338_v3   ;;  %578 = vperm.xlu1 %2697, %v333_v4   ;;  %v354_v11 = vld [vmem:[%s2958_s11 + $0xb0] sm:$0xff]  ;;  %v349_v21 = vld [vmem:[%s2958_s11 + $0x88] sm:$0xff]  ;;  %v344_v22 = vld [vmem:[%s2958_s11 + $0x60] sm:$0xff] }
  0x14   : > { %v358_v12 = vld [vmem:[%s2958_s11 + $0xd0] sm:$0xff]  ;;  %v353_v23 = vld [vmem:[%s2958_s11 + $0xa8] sm:$0xff]  ;;  %v347_v24 = vld [vmem:[%s2958_s11 + $0x78] sm:$0xff] }
  0x15   : > { %v357_v25 = vld [vmem:[%s2958_s11 + $0xc8] sm:$0xff]  ;;  %v348_v27 = vld [vmem:[%s2958_s11 + $0x80] sm:$0xff]  ;;  %v362_v28 = vld [vmem:[%s2958_s11 + $0xf0] sm:$0xff] }
  0x16   : > { %v3001_v26 = vld [vmem:[%s2958_s11 + $0xe8] sm:$0xff]  ;;  %v351_v29 = vld [vmem:[%s2958_s11 + $0x98] sm:$0xff]  ;;  %v352_v30 = vld [vmem:[%s2958_s11 + $0xa0] sm:$0xff] }
  0x17   : > { %605 = vperm.xlu0 %2699, %v342_v5   ;;  %2698 = vset.pattern.permute.xlu1 %v2893_v7  ;;  %v355_v33 = vld [vmem:[%s2958_s11 + $0xb8] sm:$0xff]  ;;  %v356_v39 = vld [vmem:[%s2958_s11 + $0xc0] sm:$0xff] }
  0x18   : > { %376 = vperm.xlu1 %2698, %v335_v6   ;;  %v359_v47 = vld [vmem:[%s2958_s11 + $0xd8] sm:$0xff]  ;;  %v360_v63 = vld [vmem:[%s2958_s11 + $0xe0] sm:$0xff] }
  0x1b   : > { %617 = vperm.xlu0 %2699, %v346_v8  }
  0x1c   : > { %2700 = vset.pattern.permute.xlu1 %v2892_v0 }
  0x1d   : > { %584 = vperm.xlu1 %2700, %v335_v6  }
  0x1f   : > { %629 = vperm.xlu0 %2699, %v350_v9  }
  0x21   : > { %2701 = vset.pattern.permute.xlu1 %v2893_v7 }
  0x22   : > { %379 = vperm.xlu1 %2701, %v336_v10  }
  0x23   : > { %641 = vperm.xlu0 %2699, %v354_v11  }
  0x26   : > { %2702 = vset.pattern.permute.xlu1 %v2892_v0 }
  0x27   : > { %653 = vperm.xlu0 %2699, %v358_v12   ;;  %587 = vperm.xlu1 %2702, %v336_v10  }
  0x2b   : > { %2724 = vset.pattern.permute.xlu0 %v2893_v7  ;;  %590 = vperm.xlu1 %2702, %v337_v13  }
  0x2c   : > { %367 = vperm.xlu0 %2724, %v332_v2  }
  0x2f   : > { %2703 = vset.pattern.permute.xlu1 %v2893_v7 }
  0x30   : > { %370 = vperm.xlu0 %2724, %v333_v4   ;;  %388 = vperm.xlu1 %2703, %v339_v14  }
  0x34   : > { %373 = vperm.xlu0 %2724, %v334_v1   ;;  %2704 = vset.pattern.permute.xlu1 %v2892_v0 }
  0x35   : > { %596 = vperm.xlu1 %2704, %v339_v14  }
  0x38   : > { %382 = vperm.xlu0 %2724, %v337_v13  }
  0x39   : > { %2705 = vset.pattern.permute.xlu1 %v2893_v7 }
  0x3a   : > { %391 = vperm.xlu1 %2705, %v340_v17  }
  0x3c   : > { %385 = vperm.xlu0 %2724, %v338_v3  }
  0x3e   : > { %2706 = vset.pattern.permute.xlu1 %v2892_v0 }
  0x3f   : > { %599 = vperm.xlu1 %2706, %v340_v17  }
  0x40   : > { %394 = vperm.xlu0 %2724, %v341_v18  }
  0x43   : > { %602 = vperm.xlu1 %2706, %v341_v18  }
  0x44   : > { %397 = vperm.xlu0 %2724, %v342_v5  }
  0x47   : > { %2707 = vset.pattern.permute.xlu1 %v2893_v7 }
  0x48   : > { %400 = vperm.xlu1 %2707, %v343_v19   ;;  %406 = vperm.xlu0 %2724, %v345_v20  }
  0x4c   : > { %2708 = vset.pattern.permute.xlu1 %v2892_v0  ;;  %409 = vperm.xlu0 %2724, %v346_v8  }
  0x4d   : > { %608 = vperm.xlu1 %2708, %v343_v19  }
  0x50   : > { %418 = vperm.xlu0 %2724, %v349_v21  }
  0x51   : > { %2709 = vset.pattern.permute.xlu1 %v2893_v7 }
  0x52   : > { %403 = vperm.xlu1 %2709, %v344_v22  }
  0x54   : > { %421 = vperm.xlu0 %2724, %v350_v9  }
  0x56   : > { %2710 = vset.pattern.permute.xlu1 %v2892_v0 }
  0x57   : > { %611 = vperm.xlu1 %2710, %v344_v22  }
  0x58   : > { %430 = vperm.xlu0 %2724, %v353_v23  }
  0x5b   : > { %614 = vperm.xlu1 %2710, %v345_v20  }
  0x5c   : > { %433 = vperm.xlu0 %2724, %v354_v11  }
  0x5f   : > { %2711 = vset.pattern.permute.xlu1 %v2893_v7 }
  0x60   : > { %412 = vperm.xlu1 %2711, %v347_v24   ;;  %442 = vperm.xlu0 %2724, %v357_v25  }
  0x64   : > { %2712 = vset.pattern.permute.xlu1 %v2892_v0  ;;  %445 = vperm.xlu0 %2724, %v358_v12  }
  0x65   : > { %620 = vperm.xlu1 %2712, %v347_v24  }
  0x68   : > { %454 = vperm.xlu0 %2724, %v3001_v26  }
  0x69   : > { %2713 = vset.pattern.permute.xlu1 %v2893_v7 }
  0x6a   : > { %415 = vperm.xlu1 %2713, %v348_v27  }
  0x6c   : > { %457 = vperm.xlu0 %2724, %v362_v28  }
  0x6e   : > { %2714 = vset.pattern.permute.xlu1 %v2892_v0 }
  0x6f   : > { %623 = vperm.xlu1 %2714, %v348_v27  }
  0x70   : > { %2729 = vset.pattern.permute.xlu0 %v2892_v0 }
  0x71   : > { %665 = vperm.xlu0 %2729, %v362_v28  }
  0x73   : > { %626 = vperm.xlu1 %2714, %v349_v21  }
  0x77   : > { %2715 = vset.pattern.permute.xlu1 %v2893_v7 }
  0x78   : > { %424 = vperm.xlu1 %2715, %v351_v29  }
  0x7c   : > { %2716 = vset.pattern.permute.xlu1 %v2892_v0 }
  0x7d   : > { %632 = vperm.xlu1 %2716, %v351_v29   ;;  %v363_v29 = vld [vmem:[%s2958_s11 + $0xf8] sm:$0xff] }
  0x81   : > { %2717 = vset.pattern.permute.xlu1 %v2893_v7 }
  0x82   : > { %427 = vperm.xlu1 %2717, %v352_v30  }
  0x86   : > { %2718 = vset.pattern.permute.xlu1 %v2892_v0 }
  0x87   : > { %635 = vperm.xlu1 %2718, %v352_v30  }
  0x8a   : > { %v576_v31 = vpop.permute.xlu1 %575  ;;  %v582_v32 = vpop.permute.xlu0 %581 }
  0x8b   : > { %638 = vperm.xlu1 %2718, %v353_v23   ;;  %vm670_vm3 = vcmp.eq.s32.totalorder %v576_v31, %v3034_v48  ;;  %vm672_vm4 = vcmp.eq.s32.totalorder %v582_v32, %v3034_v48 }
  0x8c   : > { %v2305_v56 = vsel %vm670_vm3, 1.0, %v2894_v51  ;;  %v2307_v57 = vsel %vm672_vm4, 1.0, %v2894_v51 }
  0x8e   : > { %v579_v34 = vpop.permute.xlu1 %578  ;;  %v3016_v35 = vpop.permute.xlu0 %593 }
  0x8f   : > { %2719 = vset.pattern.permute.xlu1 %v2893_v7  ;;  %vm671_vm1 = vcmp.eq.s32.totalorder %v579_v34, %v3034_v48  ;;  %vm676_vm13 = vcmp.eq.s32.totalorder %v3016_v35, %v3034_v48 }
  0x90   : > { %436 = vperm.xlu1 %2719, %v355_v33   ;;  %v2306_v52 = vsel %vm671_vm1, 1.0, %v2894_v51  ;;  %v2311_v17 = vsel %vm676_vm13, 1.0, %v2894_v51 }
  0x91   : > { %v766_v59 = vpack.c.bf16 %v2306_v52, %v2305_v56 }
  0x92   : > { %v3019_v36 = vpop.permute.xlu0 %605 }
  0x93   : > { %v377_v37 = vpop.permute.xlu1 %376 }
  0x94   : > { %2720 = vset.pattern.permute.xlu1 %v2892_v0  ;;  %vm465_vm7 = vcmp.eq.s32.totalorder %v377_v37, %v3034_v48 }
  0x95   : > { %644 = vperm.xlu1 %2720, %v355_v33   ;;  %v2276_v3 = vsel %vm465_vm7, 1.0, %v2894_v51 }
  0x96   : > { %v3022_v38 = vpop.permute.xlu0 %617 }
  0x98   : > { %v585_v40 = vpop.permute.xlu1 %584 }
  0x99   : > { %2721 = vset.pattern.permute.xlu1 %v2893_v7  ;;  %vm673_vm5 = vcmp.eq.s32.totalorder %v585_v40, %v3034_v48 }
  0x9a   : > { %439 = vperm.xlu1 %2721, %v356_v39   ;;  %v3026_v41 = vpop.permute.xlu0 %629  ;;  %v2308_v60 = vsel %vm673_vm5, 1.0, %v2894_v51 }
  0x9b   : > { %v767_v4 = vpack.c.bf16 %v2308_v60, %v2307_v57 }
  0x9d   : > { %v380_v42 = vpop.permute.xlu1 %379 }
  0x9e   : > { %2722 = vset.pattern.permute.xlu1 %v2892_v0  ;;  %v3029_v43 = vpop.permute.xlu0 %641  ;;  %vm466_vm11 = vcmp.eq.s32.totalorder %v380_v42, %v3034_v48 }
  0x9f   : > { %647 = vperm.xlu1 %2722, %v356_v39   ;;  %v2277_v11 = vsel %vm466_vm11, 1.0, %v2894_v51 }
  0xa2   : > { %v588_v45 = vpop.permute.xlu1 %587  ;;  %v3031_v46 = vpop.permute.xlu0 %653 }
  0xa3   : > { %650 = vperm.xlu1 %2722, %v357_v25   ;;  %vm674_vm12 = vcmp.eq.s32.totalorder %v588_v45, %v3034_v48 }
  0xa4   : > { %v2309_v12 = vsel %vm674_vm12, 1.0, %v2894_v51 }
  0xa6   : > { %v591_v49 = vpop.permute.xlu1 %590 }
  0xa7   : > { %v368_v50 = vpop.permute.xlu0 %367  ;;  %2723 = vset.pattern.permute.xlu1 %v2893_v7  ;;  %vm675_vm9 = vcmp.eq.s32.totalorder %v591_v49, %v3034_v48 }
  0xa8   : > { %vm462_vm2 = vcmp.eq.s32.totalorder %v368_v50, %v3034_v48  ;;  %448 = vperm.xlu1 %2723, %v359_v47   ;;  %v2310_v8 = vsel %vm675_vm9, 1.0, %v2894_v51 }
  0xa9   : > { %v2273_v53 = vsel %vm462_vm2, 1.0, %v2894_v51  ;;  %v768_v15 = vpack.c.bf16 %v2310_v8, %v2309_v12 }
  0xab   : > { %v371_v54 = vpop.permute.xlu0 %370  ;;  %v389_v55 = vpop.permute.xlu1 %388 }
  0xac   : > { %vm463_vm6 = vcmp.eq.s32.totalorder %v371_v54, %v3034_v48  ;;  %2725 = vset.pattern.permute.xlu1 %v2892_v0  ;;  %vm469_vm0 = vcmp.eq.s32.totalorder %v389_v55, %v3034_v48 }
  0xad   : > { %v2274_v58 = vsel %vm463_vm6, 1.0, %v2894_v51  ;;  %656 = vperm.xlu1 %2725, %v359_v47   ;;  %v2280_v21 = vsel %vm469_vm0, 1.0, %v2894_v51  ;;  %vm680_vm6 = vcmp.eq.s32.totalorder %v3019_v36, %v3034_v48 }
  0xae   : > { %v558_v61 = vpack.c.bf16 %v2274_v58, %v2273_v53  ;;  %v2315_v42 = vsel %vm680_vm6, 1.0, %v2894_v51 }
  0xaf   : > { %v374_v62 = vpop.permute.xlu0 %373 }
  0xb0   : > { %vm464_vm10 = vcmp.eq.s32.totalorder %v374_v62, %v3034_v48  ;;  %v597_v1 = vpop.permute.xlu1 %596  ;;  %v782_v2 = vsub.bf16 %v558_v61, %v766_v59 }
  0xb1   : > { %v2275_v5 = vsel %vm464_vm10, 1.0, %v2894_v51  ;;  %2726 = vset.pattern.permute.xlu1 %v2893_v7  ;;  %vm677_vm14 = vcmp.eq.s32.totalorder %v597_v1, %v3034_v48  ;;  %vm1468_vm10 = vcmask 1041408  }
  0xb2   : > { %v559_v6 = vpack.c.bf16 %v2276_v3, %v2275_v5  ;;  %451 = vperm.xlu1 %2726, %v360_v63   ;;  %2538 = vmatprep.mubr.msk.bf16.mxu0 %vm799_vm8, %v782_v2  ;;  %v2312_v18 = vsel %vm677_vm14, 1.0, %v2894_v51 }
  0xb3   : > { %v383_v9 = vpop.permute.xlu0 %382  ;;  %v769_v23 = vpack.c.bf16 %v2312_v18, %v2311_v17 }
  0xb4   : > { %v783_v10 = vsub.bf16 %v559_v6, %v767_v4  ;;  %vm467_vm15 = vcmp.eq.s32.totalorder %v383_v9, %v3034_v48 }
  0xb5   : > { %v2278_v13 = vsel %vm467_vm15, 1.0, %v2894_v51  ;;  %v392_v14 = vpop.permute.xlu1 %391 }
  0xb6   : > { %v560_v16 = vpack.c.bf16 %v2278_v13, %v2277_v11  ;;  %2727 = vset.pattern.permute.xlu1 %v2892_v0  ;;  %2539 = vmatmul.mubr.msk.bf16.vlgmr.msra.gmra.mxu0 %vm799_vm8, %v783_v10  ;;  %vm470_vm3 = vcmp.eq.s32.totalorder %v392_v14, %v3034_v48 }
  0xb7   : > { %v386_v19 = vpop.permute.xlu0 %385  ;;  %659 = vperm.xlu1 %2727, %v360_v63   ;;  %v2281_v32 = vsel %vm470_vm3, 1.0, %v2894_v51 }
  0xb8   : > { %v784_v20 = vsub.bf16 %v560_v16, %v768_v15  ;;  %vm468_vm1 = vcmp.eq.s32.totalorder %v386_v19, %v3034_v48 }
  0xb9   : > { %v2279_v22 = vsel %vm468_vm1, 1.0, %v2894_v51 }
  0xba   : > { %v561_v24 = vpack.c.bf16 %v2280_v21, %v2279_v22  ;;  %2542 = vmatprep.mubr.msk.bf16.mxu0 %vm799_vm8, %v784_v20  ;;  %v600_v25 = vpop.permute.xlu1 %599 }
  0xbb   : > { %v395_v27 = vpop.permute.xlu0 %394  ;;  %662 = vperm.xlu1 %2727, %v3001_v26   ;;  %vm678_vm4 = vcmp.eq.s32.totalorder %v600_v25, %v3034_v48 }
  0xbc   : > { %v785_v28 = vsub.bf16 %v561_v24, %v769_v23  ;;  %vm471_vm2 = vcmp.eq.s32.totalorder %v395_v27, %v3034_v48  ;;  %v2313_v26 = vsel %vm678_vm4, 1.0, %v2894_v51  ;;  %v2732_v24 = vld [vmem:[%s3527_s3 + $0x10] sm:$0xff]  }
  0xbd   : > { %v2282_v30 = vsel %vm471_vm2, 1.0, %v2894_v51  ;;  %vm684_vm2 = vcmp.eq.s32.totalorder %v3022_v38, %v3034_v48 }
  0xbe   : > { %2543 = vmatmul.mubr.msk.bf16.gmra.mxu0 %vm799_vm8, %v785_v28  ;;  %v603_v31 = vpop.permute.xlu1 %602  ;;  %v562_v34 = vpack.c.bf16 %v2282_v30, %v2281_v32  ;;  %v2319_v6 = vsel %vm684_vm2, 1.0, %v2894_v51 }
  0xbf   : > { %vm679_vm5 = vcmp.eq.s32.totalorder %v603_v31, %v3034_v48  ;;  %2728 = vset.pattern.permute.xlu1 %v2893_v7  ;;  %v398_v37 = vpop.permute.xlu0 %397  ;;  %v2731_v7 = vld [vmem:[%s3527_s3 + $0x18] ss:$0 sps:$4 sm:$0x33]  }
  0xc0   : > { %v2314_v33 = vsel %vm679_vm5, 1.0, %v2894_v51  ;;  %460 = vperm.xlu1 %2728, %v363_v29   ;;  %vm472_vm7 = vcmp.eq.s32.totalorder %v398_v37, %v3034_v48  ;;  %2685 = vmatprep.subr.msk.bf16.mxu0 %vm1468_vm10, %v2731_v7  ;;  %v1470_v36 = vsel %vm1468_vm10, %v2731_v7, 0  ;;  %v2736_v37 = vld [vmem:[%s3157_s28] sm:$0xff]  }
  0xc1   : > { %v770_v35 = vpack.c.bf16 %v2314_v33, %v2313_v26  ;;  %v2283_v44 = vsel %vm472_vm7, 1.0, %v2894_v51  ;;  %2605 = vmatpush3.bf16.msra.mxu0 %v1470_v36  ;;  %v2734_v26 = vld [vmem:[%s3528_s4] sm:$0xff]   ;;  %v2738_v36 = vld [vmem:[%s3157_s28 + $0x10] sm:$0xff]  }
  0xc2   : > { %2606 = vmatprep.subr.bf16.mxu0 %v2732_v24  ;;  %v2735_v33 = vld [vmem:[%s3527_s3] sm:$0xff]   ;;  %2570 = vmatprep.subr.bf16.mxu1 %v2734_v26 }
  0xc3   : > { %v786_v39 = vsub.bf16 %v562_v34, %v770_v35  ;;  %v401_v40 = vpop.permute.xlu1 %400  ;;  %v407_v54 = vpop.permute.xlu0 %406  ;;  %2571 = vmatpush3.bf16.msra.mxu1 %v2734_v26 }
  0xc4   : > { %2730 = vset.pattern.permute.xlu1 %v2892_v0  ;;  %vm473_vm9 = vcmp.eq.s32.totalorder %v401_v40, %v3034_v48  ;;  %vm475_vm12 = vcmp.eq.s32.totalorder %v407_v54, %v3034_v48  ;;  %v2737_v40 = vld [vmem:[%s3157_s28 + $0x8] sm:$0xff]  }
  0xc5   : > { %668 = vperm.xlu1 %2730, %v363_v29   ;;  %2546 = vmatprep.mubr.msk.bf16.mxu0 %vm799_vm8, %v786_v39  ;;  %v2284_v0 = vsel %vm473_vm9, 1.0, %v2894_v51  ;;  %v2286_v56 = vsel %vm475_vm12, 1.0, %v2894_v51  ;;  %v2733_v29 = vld [vmem:[%s3527_s3 + $0x8] sm:$0xff]  }
  0xc6   : > { %v563_v49 = vpack.c.bf16 %v2284_v0, %v2283_v44  ;;  %2607 = vmatpush3.bf16.msra.mxu0 %v2732_v24  ;;  %v2742_v24 = vld [vmem:[%s3157_s28 + $0x30] sm:$0xff]  }
  0xc7   : > { %v410_v63 = vpop.permute.xlu0 %409  ;;  %2608 = vmatprep.subr.bf16.mxu0 %v2733_v29 }
  0xc8   : > { %v609_v45 = vpop.permute.xlu1 %608  ;;  %vm476_vm0 = vcmp.eq.s32.totalorder %v410_v63, %v3034_v48 }
  0xc9   : > { %vm681_vm11 = vcmp.eq.s32.totalorder %v609_v45, %v3034_v48  ;;  %v2287_v3 = vsel %vm476_vm0, 1.0, %v2894_v51 }
  0xca   : > { %v2316_v47 = vsel %vm681_vm11, 1.0, %v2894_v51  ;;  %vm688_vm11 = vcmp.eq.s32.totalorder %v3026_v41, %v3034_v48  ;;  %2609 = vmatpush3.bf16.msra.mxu0 %v2733_v29 }
  0xcb   : > { %v771_v50 = vpack.c.bf16 %v2316_v47, %v2315_v42  ;;  %v419_v13 = vpop.permute.xlu0 %418  ;;  %v2323_v30 = vsel %vm688_vm11, 1.0, %v2894_v51  ;;  %2610 = vmatprep.subr.bf16.mxu0 %v2735_v33 }
  0xcc   : > { %vm479_vm4 = vcmp.eq.s32.totalorder %v419_v13, %v3034_v48 }
  0xcd   : > { %v787_v52 = vsub.bf16 %v563_v49, %v771_v50  ;;  %v404_v53 = vpop.permute.xlu1 %403  ;;  %v2290_v38 = vsel %vm479_vm4, 1.0, %v2894_v51  ;;  %v2739_v49 = vld [vmem:[%s3157_s28 + $0x18] sm:$0xff]  }
  0xce   : > { %vm474_vm13 = vcmp.eq.s32.totalorder %v404_v53, %v3034_v48  ;;  %2611 = vmatpush3.bf16.msra.mxu0 %v2735_v33 }
  0xcf   : > { %2547 = vmatmul.mubr.msk.bf16.gmra.mxu0 %vm799_vm8, %v787_v52  ;;  %v2285_v57 = vsel %vm474_vm13, 1.0, %v2894_v51  ;;  %v422_v23 = vpop.permute.xlu0 %421  ;;  %vm1188_vm13 = vcmask 130048  }
  0xd0   : > { %v564_v61 = vpack.c.bf16 %v2286_v56, %v2285_v57  ;;  %vm480_vm9 = vcmp.eq.s32.totalorder %v422_v23, %v3034_v48  ;;  %2572 = vmatprep.mubr.msk.bf16.mxu1 %vm1188_vm13, %v2736_v37 }
  0xd1   : > { %v2291_v25 = vsel %vm480_vm9, 1.0, %v2894_v51  ;;  %2573 = vmatmul.mubr.msk.bf16.vlgmr.msra.gmra.mxu1 %vm1188_vm13, %v2737_v40 }
  0xd2   : > { %v612_v55 = vpop.permute.xlu1 %611  ;;  %2576 = vmatprep.mubr.msk.bf16.mxu1 %vm1188_vm13, %v2738_v36 }
  0xd3   : > { %vm682_vm14 = vcmp.eq.s32.totalorder %v612_v55, %v3034_v48  ;;  %v431_v39 = vpop.permute.xlu0 %430 }
  0xd4   : > { %v2317_v59 = vsel %vm682_vm14, 1.0, %v2894_v51  ;;  %vm483_vm14 = vcmp.eq.s32.totalorder %v431_v39, %v3034_v48 }
  0xd5   : > { %v2294_v42 = vsel %vm483_vm14, 1.0, %v2894_v51 }
  0xd6   : > { %v615_v58 = vpop.permute.xlu1 %614 }
  0xd7   : > { %vm683_vm15 = vcmp.eq.s32.totalorder %v615_v58, %v3034_v48  ;;  %v434_v55 = vpop.permute.xlu0 %433 }
  0xd8   : > { %v2318_v60 = vsel %vm683_vm15, 1.0, %v2894_v51  ;;  %vm484_vm4 = vcmp.eq.s32.totalorder %v434_v55, %v3034_v48 }
  0xd9   : > { %v772_v62 = vpack.c.bf16 %v2318_v60, %v2317_v59  ;;  %2577 = vmatmul.mubr.msk.bf16.gmra.mxu1 %vm1188_vm13, %v2739_v49  ;;  %v2295_v59 = vsel %vm484_vm4, 1.0, %v2894_v51  ;;  %v2745_v49 = vld [vmem:[%s3157_s28 + $0x48] sm:$0xff]  }
  0xdb   : > { %v788_v1 = vsub.bf16 %v564_v61, %v772_v62  ;;  %v413_v2 = vpop.permute.xlu1 %412 }
  0xdc   : > { %vm477_vm1 = vcmp.eq.s32.totalorder %v413_v2, %v3034_v48  ;;  %v2741_v2 = vld [vmem:[%s3157_s28 + $0x28] sm:$0xff]  }
  0xdd   : > { %2550 = vmatprep.mubr.msk.bf16.mxu0 %vm799_vm8, %v788_v1  ;;  %v2288_v4 = vsel %vm477_vm1, 1.0, %v2894_v51 }
  0xde   : > { %v565_v9 = vpack.c.bf16 %v2288_v4, %v2287_v3  ;;  %v443_v4 = vpop.permute.xlu0 %442 }
  0xe0   : > { %v621_v5 = vpop.permute.xlu1 %620 }
  0xe1   : > { %vm685_vm3 = vcmp.eq.s32.totalorder %v621_v5, %v3034_v48 }
  0xe2   : > { %v2320_v8 = vsel %vm685_vm3, 1.0, %v2894_v51  ;;  %vm692_vm3 = vcmp.eq.s32.totalorder %v3029_v43, %v3034_v48  ;;  %v2740_v43 = vld [vmem:[%s3157_s28 + $0x20] sm:$0xff]  }
  0xe3   : > { %v773_v10 = vpack.c.bf16 %v2320_v8, %v2319_v6  ;;  %v2327_v58 = vsel %vm692_vm3, 1.0, %v2894_v51  ;;  %2580 = vmatprep.mubr.msk.bf16.mxu1 %vm1188_vm13, %v2740_v43 }
  0xe4   : > { %2581 = vmatmul.mubr.msk.bf16.gmra.mxu1 %vm1188_vm13, %v2741_v2 }
  0xe5   : > { %v789_v11 = vsub.bf16 %v565_v9, %v773_v10  ;;  %v416_v12 = vpop.permute.xlu1 %415  ;;  %2584 = vmatprep.mubr.msk.bf16.mxu1 %vm1188_vm13, %v2742_v24 }
  0xe6   : > { %vm478_vm5 = vcmp.eq.s32.totalorder %v416_v12, %v3034_v48 }
  0xe7   : > { %2551 = vmatmul.mubr.msk.bf16.gmra.mxu0 %vm799_vm8, %v789_v11  ;;  %v2289_v15 = vsel %vm478_vm5, 1.0, %v2894_v51 }
  0xe8   : > { %v566_v19 = vpack.c.bf16 %v2290_v38, %v2289_v15  ;;  %v446_v38 = vpop.permute.xlu0 %445 }
  0xe9   : > { %vm488_vm14 = vcmp.eq.s32.totalorder %v446_v38, %v3034_v48 }
  0xea   : > { %v624_v14 = vpop.permute.xlu1 %623 }
  0xeb   : > { %vm686_vm6 = vcmp.eq.s32.totalorder %v624_v14, %v3034_v48 }
  0xec   : > { %v2321_v17 = vsel %vm686_vm6, 1.0, %v2894_v51 }
  0xee   : > { %v627_v16 = vpop.permute.xlu1 %626 }
  0xef   : > { %vm687_vm7 = vcmp.eq.s32.totalorder %v627_v16, %v3034_v48 }
  0xf0   : > { %v2322_v18 = vsel %vm687_vm7, 1.0, %v2894_v51  ;;  %vm487_vm7 = vcmp.eq.s32.totalorder %v443_v4, %v3034_v48 }
  0xf1   : > { %v774_v20 = vpack.c.bf16 %v2322_v18, %v2321_v17  ;;  %v2298_v8 = vsel %vm487_vm7, 1.0, %v2894_v51  ;;  %v2299_v18 = vsel %vm488_vm14, 1.0, %v2894_v51 }
  0xf3   : > { %v790_v21 = vsub.bf16 %v566_v19, %v774_v20  ;;  %v425_v22 = vpop.permute.xlu1 %424 }
  0xf4   : > { %vm481_vm10 = vcmp.eq.s32.totalorder %v425_v22, %v3034_v48 }
  0xf5   : > { %2554 = vmatprep.mubr.msk.bf16.mxu0 %vm799_vm8, %v790_v21  ;;  %v2292_v27 = vsel %vm481_vm10, 1.0, %v2894_v51 }
  0xf6   : > { %v567_v32 = vpack.c.bf16 %v2292_v27, %v2291_v25  ;;  %v2743_v25 = vld [vmem:[%s3157_s28 + $0x38] sm:$0xff]  }
  0xf7   : > { %2585 = vmatmul.mubr.msk.bf16.gmra.mxu1 %vm1188_vm13, %v2743_v25 }
  0xf8   : > { %v633_v28 = vpop.permute.xlu1 %632 }
  0xf9   : > { %vm689_vm12 = vcmp.eq.s32.totalorder %v633_v28, %v3034_v48 }
  0xfa   : > { %v2324_v31 = vsel %vm689_vm12, 1.0, %v2894_v51  ;;  %vm696_vm12 = vcmp.eq.s32.totalorder %v3031_v46, %v3034_v48  ;;  %v455_v46 = vpop.permute.xlu0 %454 }
  0xfb   : > { %v775_v41 = vpack.c.bf16 %v2324_v31, %v2323_v30  ;;  %v2331_v17 = vsel %vm696_vm12, 1.0, %v2894_v51 }
  0xfd   : > { %v791_v34 = vsub.bf16 %v567_v32, %v775_v41  ;;  %v428_v35 = vpop.permute.xlu1 %427 }
  0xfe   : > { %vm482_vm15 = vcmp.eq.s32.totalorder %v428_v35, %v3034_v48  ;;  %v458_v28 = vpop.permute.xlu0 %457 }
  0xff   : > { %2555 = vmatmul.mubr.msk.bf16.gmra.mxu0 %vm799_vm8, %v791_v34  ;;  %v2293_v44 = vsel %vm482_vm15, 1.0, %v2894_v51 }
 0x100   : > { %v568_v50 = vpack.c.bf16 %v2294_v42, %v2293_v44 }
 0x102   : > { %v636_v7 = vpop.permute.xlu1 %635  ;;  %v666_v34 = vpop.permute.xlu0 %665 }
 0x103   : > { %vm690_vm0 = vcmp.eq.s32.totalorder %v636_v7, %v3034_v48 }
 0x104   : > { %v2325_v45 = vsel %vm690_vm0, 1.0, %v2894_v51 }
 0x106   : > { %v639_v0 = vpop.permute.xlu1 %638 }
 0x107   : > { %vm691_vm1 = vcmp.eq.s32.totalorder %v639_v0, %v3034_v48 }
 0x108   : > { %v2326_v47 = vsel %vm691_vm1, 1.0, %v2894_v51  ;;  %vm491_vm1 = vcmp.eq.s32.totalorder %v455_v46, %v3034_v48 }
 0x109   : > { %v776_v52 = vpack.c.bf16 %v2326_v47, %v2325_v45  ;;  %v2302_v31 = vsel %vm491_vm1, 1.0, %v2894_v51  ;;  %v2744_v47 = vld [vmem:[%s3157_s28 + $0x40] sm:$0xff]  }
 0x10a   : > { %2588 = vmatprep.mubr.msk.bf16.mxu1 %vm1188_vm13, %v2744_v47 }
 0x10b   : > { %v792_v53 = vsub.bf16 %v568_v50, %v776_v52  ;;  %v437_v54 = vpop.permute.xlu1 %436  ;;  %2589 = vmatmul.mubr.msk.bf16.gmra.mxu1 %vm1188_vm13, %v2745_v49  ;;  %v2746_v50 = vld [vmem:[%s3157_s28 + $0x50] sm:$0xff]   ;;  %v2747_v52 = vld [vmem:[%s3157_s28 + $0x58] sm:$0xff]  }
 0x10c   : > { %vm485_vm2 = vcmp.eq.s32.totalorder %v437_v54, %v3034_v48  ;;  %2592 = vmatprep.mubr.msk.bf16.mxu1 %vm1188_vm13, %v2746_v50  ;;  %v2749_v54 = vld [vmem:[%s3157_s28 + $0x68] sm:$0xff]  }
 0x10d   : > { %2558 = vmatprep.mubr.msk.bf16.mxu0 %vm799_vm8, %v792_v53  ;;  %v2296_v56 = vsel %vm485_vm2, 1.0, %v2894_v51  ;;  %v2748_v53 = vld [vmem:[%s3157_s28 + $0x60] sm:$0xff]  }
 0x10e   : > { %v569_v61 = vpack.c.bf16 %v2296_v56, %v2295_v59 }
 0x110   : > { %v645_v57 = vpop.permute.xlu1 %644 }
 0x111   : > { %vm693_vm5 = vcmp.eq.s32.totalorder %v645_v57, %v3034_v48 }
 0x112   : > { %v2328_v60 = vsel %vm693_vm5, 1.0, %v2894_v51  ;;  %vm700_vm5 = vcmp.eq.s32.totalorder %v666_v34, %v3034_v48 }
 0x113   : > { %v777_v62 = vpack.c.bf16 %v2328_v60, %v2327_v58  ;;  %v2335_v40 = vsel %vm700_vm5, 1.0, %v2894_v51  ;;  %2593 = vmatmul.mubr.msk.bf16.gmra.mxu1 %vm1188_vm13, %v2747_v52  ;;  %v2752_v52 = vld [vmem:[%s3530_s6 + $0x18] sm:$0xff]  }
 0x114   : > { %2596 = vmatprep.mubr.msk.bf16.mxu1 %vm1188_vm13, %v2748_v53  ;;  %2644 = vmatprep.subr.bf16.mxu1 %v2752_v52  ;;  %v2754_v53 = vld [vmem:[%s3530_s6 + $0x8] sm:$0xff]  }
 0x115   : > { %v793_v63 = vsub.bf16 %v569_v61, %v777_v62  ;;  %v440_v1 = vpop.permute.xlu1 %439  ;;  %2645 = vmatpush3.bf16.msra.mxu1 %v2752_v52 }
 0x116   : > { %vm486_vm6 = vcmp.eq.s32.totalorder %v440_v1, %v3034_v48 }
 0x117   : > { %2559 = vmatmul.mubr.msk.bf16.gmra.mxu0 %vm799_vm8, %v793_v63  ;;  %v2297_v5 = vsel %vm486_vm6, 1.0, %v2894_v51  ;;  %vm492_vm6 = vcmp.eq.s32.totalorder %v458_v28, %v3034_v48 }
 0x118   : > { %v570_v11 = vpack.c.bf16 %v2298_v8, %v2297_v5  ;;  %v2303_v42 = vsel %vm492_vm6, 1.0, %v2894_v51 }
 0x11a   : > { %v648_v3 = vpop.permute.xlu1 %647 }
 0x11b   : > { %vm694_vm9 = vcmp.eq.s32.totalorder %v648_v3, %v3034_v48  ;;  %2597 = vmatmul.mubr.msk.bf16.gmra.mxu1 %vm1188_vm13, %v2749_v54  ;;  %v2755_v54 = vld [vmem:[%s3530_s6] sm:$0xff]  }
 0x11c   : > { %v2329_v9 = vsel %vm694_vm9, 1.0, %v2894_v51  ;;  %vm2161_vm9 = vcmask 261120  }
 0x11e   : > { %v651_v6 = vpop.permute.xlu1 %650 }
 0x11f   : > { %vm695_vm10 = vcmp.eq.s32.totalorder %v651_v6, %v3034_v48 }
 0x120   : > { %v2330_v10 = vsel %vm695_vm10, 1.0, %v2894_v51 }
 0x121   : > { %v778_v12 = vpack.c.bf16 %v2330_v10, %v2329_v9  ;;  %v2750_v10 = vld [vmem:[%s3157_s28 + $0x70] sm:$0xff]  }
 0x122   : > { %2600 = vmatprep.mubr.msk.bf16.mxu1 %vm1188_vm13, %v2750_v10 }
 0x123   : > { %v794_v13 = vsub.bf16 %v570_v11, %v778_v12  ;;  %v449_v14 = vpop.permute.xlu1 %448  ;;  %v2751_v11 = vld [vmem:[%s3157_s28 + $0x78] sm:$0xff]  }
 0x124   : > { %vm489_vm11 = vcmp.eq.s32.totalorder %v449_v14, %v3034_v48  ;;  %2601 = vmatmul.mubr.msk.bf16.gmra.mxu1 %vm1188_vm13, %v2751_v11  ;;  %vm1951_vm13 = vcmask 523264  }
 0x125   : > { %2562 = vmatprep.mubr.msk.bf16.mxu0 %vm799_vm8, %v794_v13  ;;  %v2300_v15 = vsel %vm489_vm11, 1.0, %v2894_v51 }
 0x126   : > { %v571_v20 = vpack.c.bf16 %v2300_v15, %v2299_v18 }
 0x128   : > { %v657_v16 = vpop.permute.xlu1 %656 }
 0x129   : > { %vm697_vm15 = vcmp.eq.s32.totalorder %v657_v16, %v3034_v48 }
 0x12a   : > { %v2332_v19 = vsel %vm697_vm15, 1.0, %v2894_v51 }
 0x12b   : > { %v779_v21 = vpack.c.bf16 %v2332_v19, %v2331_v17 }
 0x12d   : > { %v795_v22 = vsub.bf16 %v571_v20, %v779_v21  ;;  %v452_v23 = vpop.permute.xlu1 %451 }
 0x12e   : > { %vm490_vm0 = vcmp.eq.s32.totalorder %v452_v23, %v3034_v48 }
 0x12f   : > { %2563 = vmatmul.mubr.msk.bf16.gmra.mxu0 %vm799_vm8, %v795_v22  ;;  %v2301_v29 = vsel %vm490_vm0, 1.0, %v2894_v51 }
 0x130   : > { %v572_v26 = vpack.c.bf16 %v2302_v31, %v2301_v29 }
 0x132   : > { %v660_v27 = vpop.permute.xlu1 %659 }
 0x133   : > { %vm698_vm2 = vcmp.eq.s32.totalorder %v660_v27, %v3034_v48 }
 0x134   : > { %v2333_v32 = vsel %vm698_vm2, 1.0, %v2894_v51 }
 0x136   : > { %v663_v30 = vpop.permute.xlu1 %662 }
 0x137   : > { %vm699_vm3 = vcmp.eq.s32.totalorder %v663_v30, %v3034_v48 }
 0x138   : > { %v2334_v41 = vsel %vm699_vm3, 1.0, %v2894_v51 }
 0x139   : > { %v780_v33 = vpack.c.bf16 %v2334_v41, %v2333_v32 }
 0x13b   : > { %v796_v35 = vsub.bf16 %v572_v26, %v780_v33  ;;  %v461_v37 = vpop.permute.xlu1 %460 }
 0x13c   : > { %vm493_vm4 = vcmp.eq.s32.totalorder %v461_v37, %v3034_v48 }
 0x13d   : > { %2566 = vmatprep.mubr.msk.bf16.mxu0 %vm799_vm8, %v796_v35  ;;  %v2304_v39 = vsel %vm493_vm4, 1.0, %v2894_v51 }
 0x13e   : > { %v573_v0 = vpack.c.bf16 %v2304_v39, %v2303_v42 }
 0x140   : > { %v669_v7 = vpop.permute.xlu1 %668 }
 0x141   : > { %vm701_vm7 = vcmp.eq.s32.totalorder %v669_v7, %v3034_v48 }
 0x142   : > { %v2336_v44 = vsel %vm701_vm7, 1.0, %v2894_v51 }
 0x143   : > { %v781_v45 = vpack.c.bf16 %v2336_v44, %v2335_v40 }
 0x145   : > { %v797_v36 = vsub.bf16 %v573_v0, %v781_v45 }
 0x147   : > { %2567 = vmatmul.mubr.msk.bf16.gmra.mxu0 %vm799_vm8, %v797_v36  ;;  %vm1419_vm8 = vcmask 424960  }
 0x176   : > { %v2540_v48 = vpop.f32.mrf.mxu0 }
 0x177   : > { %v1015_v60 = vmul.f32 %v2540_v48, %v2540_v48 }
 0x178   : > { %v886_v51 = vpop.f32.mrf.mxu0 }
 0x179   : > { %v1013_v58 = vmul.f32 %v886_v51, %v886_v51  ;;  %v2753_v51 = vld [vmem:[%s3530_s6 + $0x10] sm:$0xff]  }
 0x17a   : > { %v2541_v55 = vpop.f32.mrf.mxu0  ;;  %2646 = vmatprep.subr.bf16.mxu1 %v2753_v51 }
 0x17b   : > { %v1016_v56 = vmul.f32 %v2541_v55, %v2541_v55  ;;  %2647 = vmatpush3.bf16.msra.mxu1 %v2753_v51 }
 0x17c   : > { %v889_v57 = vpop.f32.mrf.mxu0  ;;  %2648 = vmatprep.subr.bf16.mxu1 %v2754_v53 }
 0x17d   : > { %v1014_v59 = vmul.f32 %v889_v57, %v889_v57  ;;  %v1046_v63 = vpack.c.bf16 %v1016_v56, %v1015_v60 }
 0x17e   : > { %v2544_v61 = vpop.f32.mrf.mxu0 }
 0x17f   : > { %v1045_v62 = vpack.c.bf16 %v1014_v59, %v1013_v58  ;;  %v1019_v6 = vmul.f32 %v2544_v61, %v2544_v61  ;;  %2649 = vmatpush3.bf16.msra.mxu1 %v2754_v53 }
 0x180   : > { %v902_v1 = vpop.f32.mrf.mxu0  ;;  %2650 = vmatprep.subr.bf16.mxu1 %v2755_v54 }
 0x181   : > { %2612 = vmatprep.mubr.msk.bf16.mxu0 %vm1419_vm8, %v1045_v62  ;;  %v1017_v4 = vmul.f32 %v902_v1, %v902_v1 }
 0x182   : > { %v2545_v43 = vpop.f32.mrf.mxu0  ;;  %2613 = vmatmul.mubr.msk.bf16.vlgmr.msra.gmra.mxu0 %vm1419_vm8, %v1046_v63 }
 0x183   : > { %v1020_v2 = vmul.f32 %v2545_v43, %v2545_v43  ;;  %2651 = vmatpush3.bf16.msra.mxu1 %v2755_v54 }
 0x184   : > { %v905_v3 = vpop.f32.mrf.mxu0 }
 0x185   : > { %v1018_v5 = vmul.f32 %v905_v3, %v905_v3  ;;  %v1048_v9 = vpack.c.bf16 %v1020_v2, %v1019_v6 }
 0x187   : > { %v1047_v8 = vpack.c.bf16 %v1018_v5, %v1017_v4 }
 0x189   : > { %2616 = vmatprep.mubr.msk.bf16.mxu0 %vm1419_vm8, %v1047_v8 }
 0x18a   : > { %2617 = vmatmul.mubr.msk.bf16.gmra.mxu0 %vm1419_vm8, %v1048_v9 }
 0x18f   : > { %v2548_v12 = vpop.f32.mrf.mxu0 }
 0x190   : > { %v1023_v18 = vmul.f32 %v2548_v12, %v2548_v12 }
 0x191   : > { %v918_v13 = vpop.f32.mrf.mxu0  ;;  %v2574_v12 = vpop.f32.mrf.mxu1 }
 0x192   : > { %v1021_v16 = vmul.f32 %v918_v13, %v918_v13 }
 0x193   : > { %v2549_v14 = vpop.f32.mrf.mxu0  ;;  %v1271_v13 = vpop.f32.mrf.mxu1 }
 0x194   : > { %v1024_v38 = vmul.f32 %v2549_v14, %v2549_v14 }
 0x195   : > { %v921_v15 = vpop.f32.mrf.mxu0  ;;  %v2575_v14 = vpop.f32.mrf.mxu1 }
 0x196   : > { %v1022_v17 = vmul.f32 %v921_v15, %v921_v15  ;;  %v1050_v20 = vpack.c.bf16 %v1024_v38, %v1023_v18 }
 0x197   : > { %v1274_v38 = vpop.f32.mrf.mxu1 }
 0x198   : > { %v1049_v19 = vpack.c.bf16 %v1022_v17, %v1021_v16  ;;  %v3279_v16 = vld [vmem:[%s3529_s5] ss:$0 sm:$0xff] }
 0x199   : > { %v2578_v17 = vpop.f32.mrf.mxu1 }
 0x19a   : > { %2620 = vmatprep.mubr.msk.bf16.mxu0 %vm1419_vm8, %v1049_v19 }
 0x19b   : > { %2621 = vmatmul.mubr.msk.bf16.gmra.mxu0 %vm1419_vm8, %v1050_v20 }
 0x1a7   : > { %v2552_v21 = vpop.f32.mrf.mxu0 }
 0x1a8   : > { %v1027_v28 = vmul.f32 %v2552_v21, %v2552_v21 }
 0x1a9   : > { %v934_v22 = vpop.f32.mrf.mxu0 }
 0x1aa   : > { %v1025_v25 = vmul.f32 %v934_v22, %v934_v22 }
 0x1ab   : > { %v2553_v23 = vpop.f32.mrf.mxu0 }
 0x1ac   : > { %v1028_v46 = vmul.f32 %v2553_v23, %v2553_v23  ;;  %v1287_v23 = vpop.f32.mrf.mxu1 }
 0x1ad   : > { %v937_v24 = vpop.f32.mrf.mxu0 }
 0x1ae   : > { %v1026_v27 = vmul.f32 %v937_v24, %v937_v24  ;;  %v1052_v30 = vpack.c.bf16 %v1028_v46, %v1027_v28 }
 0x1b0   : > { %v1051_v29 = vpack.c.bf16 %v1026_v27, %v1025_v25 }
 0x1b2   : > { %2624 = vmatprep.mubr.msk.bf16.mxu0 %vm1419_vm8, %v1051_v29 }
 0x1b3   : > { %2625 = vmatmul.mubr.msk.bf16.gmra.mxu0 %vm1419_vm8, %v1052_v30 }
 0x1bf   : > { %v2556_v31 = vpop.f32.mrf.mxu0 }
 0x1c0   : > { %v1031_v37 = vmul.f32 %v2556_v31, %v2556_v31 }
 0x1c1   : > { %v950_v32 = vpop.f32.mrf.mxu0 }
 0x1c2   : > { %v1029_v34 = vmul.f32 %v950_v32, %v950_v32  ;;  %v2579_v32 = vpop.f32.mrf.mxu1 }
 0x1c3   : > { %v2557_v41 = vpop.f32.mrf.mxu0 }
 0x1c4   : > { %v1032_v26 = vmul.f32 %v2557_v41, %v2557_v41 }
 0x1c5   : > { %v953_v33 = vpop.f32.mrf.mxu0 }
 0x1c6   : > { %v1030_v35 = vmul.f32 %v953_v33, %v953_v33  ;;  %v1054_v40 = vpack.c.bf16 %v1032_v26, %v1031_v37 }
 0x1c8   : > { %v1053_v39 = vpack.c.bf16 %v1030_v35, %v1029_v34 }
 0x1ca   : > { %2628 = vmatprep.mubr.msk.bf16.mxu0 %vm1419_vm8, %v1053_v39 }
 0x1cb   : > { %2629 = vmatmul.mubr.msk.bf16.gmra.mxu0 %vm1419_vm8, %v1054_v40 }
 0x1d7   : > { %v2560_v7 = vpop.f32.mrf.mxu0 }
 0x1d8   : > { %v1035_v49 = vmul.f32 %v2560_v7, %v2560_v7  ;;  %v1290_v7 = vpop.f32.mrf.mxu1 }
 0x1d9   : > { %v966_v42 = vpop.f32.mrf.mxu0 }
 0x1da   : > { %v1033_v36 = vmul.f32 %v966_v42, %v966_v42 }
 0x1db   : > { %v2561_v44 = vpop.f32.mrf.mxu0 }
 0x1dc   : > { %v1036_v0 = vmul.f32 %v2561_v44, %v2561_v44 }
 0x1dd   : > { %v969_v45 = vpop.f32.mrf.mxu0 }
 0x1de   : > { %v1034_v47 = vmul.f32 %v969_v45, %v969_v45  ;;  %v1056_v48 = vpack.c.bf16 %v1036_v0, %v1035_v49 }
 0x1e0   : > { %v1055_v50 = vpack.c.bf16 %v1034_v47, %v1033_v36 }
 0x1e2   : > { %2632 = vmatprep.mubr.msk.bf16.mxu0 %vm1419_vm8, %v1055_v50 }
 0x1e3   : > { %2633 = vmatmul.mubr.msk.bf16.gmra.mxu0 %vm1419_vm8, %v1056_v48  ;;  %v2582_v48 = vpop.f32.mrf.mxu1 }
 0x1e5   : > { %v1303_v54 = vpop.f32.mrf.mxu1 }
 0x1ef   : > { %v2564_v55 = vpop.f32.mrf.mxu0 }
 0x1f0   : > { %v1039_v62 = vmul.f32 %v2564_v55, %v2564_v55 }
 0x1f1   : > { %v982_v56 = vpop.f32.mrf.mxu0 }
 0x1f2   : > { %v1037_v60 = vmul.f32 %v982_v56, %v982_v56 }
 0x1f3   : > { %v2565_v57 = vpop.f32.mrf.mxu0 }
 0x1f4   : > { %v1040_v58 = vmul.f32 %v2565_v57, %v2565_v57 }
 0x1f5   : > { %v985_v59 = vpop.f32.mrf.mxu0 }
 0x1f6   : > { %v1038_v61 = vmul.f32 %v985_v59, %v985_v59  ;;  %v1058_v1 = vpack.c.bf16 %v1040_v58, %v1039_v62 }
 0x1f8   : > { %v1057_v63 = vpack.c.bf16 %v1038_v61, %v1037_v60  ;;  %v2583_v61 = vpop.f32.mrf.mxu1 }
 0x1fa   : > { %2636 = vmatprep.mubr.msk.bf16.mxu0 %vm1419_vm8, %v1057_v63 }
 0x1fb   : > { %2637 = vmatmul.mubr.msk.bf16.gmra.mxu0 %vm1419_vm8, %v1058_v1 }
 0x207   : > { %v2568_v43 = vpop.f32.mrf.mxu0 }
 0x208   : > { %v1043_v9 = vmul.f32 %v2568_v43, %v2568_v43 }
 0x209   : > { %v998_v2 = vpop.f32.mrf.mxu0 }
 0x20a   : > { %v1041_v6 = vmul.f32 %v998_v2, %v998_v2 }
 0x20b   : > { %v2569_v3 = vpop.f32.mrf.mxu0 }
 0x20c   : > { %v1044_v4 = vmul.f32 %v2569_v3, %v2569_v3 }
 0x20d   : > { %v1001_v5 = vpop.f32.mrf.mxu0 }
 0x20e   : > { %v1042_v8 = vmul.f32 %v1001_v5, %v1001_v5  ;;  %v1060_v11 = vpack.c.bf16 %v1044_v4, %v1043_v9 }
 0x210   : > { %v1059_v10 = vpack.c.bf16 %v1042_v8, %v1041_v6  ;;  %v1306_v8 = vpop.f32.mrf.mxu1 }
 0x212   : > { %2640 = vmatprep.mubr.msk.bf16.mxu0 %vm1419_vm8, %v1059_v10 }
 0x213   : > { %2641 = vmatmul.mubr.msk.bf16.gmra.mxu0 %vm1419_vm8, %v1060_v11 }
 0x242   : > { %v2614_v15 = vpop.f32.mrf.mxu0 }
 0x243   : > { %v1515_v18 = vadd.f32 %v2614_v15, %v2574_v12 }
 0x244   : > { %v1506_v19 = vpop.f32.mrf.mxu0 }
 0x245   : > { %v3282_v20 = vadd.f32 %v3279_v16, %v1515_v18  ;;  %v1507_v21 = vadd.f32 %v1506_v19, %v1271_v13 }
 0x246   : > { %v2615_v22 = vpop.f32.mrf.mxu0 }
 0x247   : > { %v2409_v46 = vmul.f32 -1.442695, %v3282_v20  ;;  %v3286_v24 = vadd.f32 %v3279_v16, %v1507_v21  ;;  %v1518_v25 = vadd.f32 %v2615_v22, %v2575_v14 }
 0x248   : > { %v1509_v27 = vpop.f32.mrf.mxu0 }
 0x249   : > { %v2407_v28 = vmul.f32 -1.442695, %v3286_v24  ;;  %v3290_v29 = vadd.f32 %v3279_v16, %v1518_v25  ;;  %v1510_v30 = vadd.f32 %v1509_v27, %v1274_v38  ;;  %2756 = vpow2.f32 %v2409_v46 }
 0x24a   : > { %v2618_v31 = vpop.f32.mrf.mxu0 }
 0x24b   : > { %2758 = vpow2.f32 %v2407_v28  ;;  %v2410_v41 = vmul.f32 -1.442695, %v3290_v29  ;;  %v3294_v26 = vadd.f32 %v3279_v16, %v1510_v30  ;;  %v1531_v33 = vadd.f32 %v2618_v31, %v2578_v17  ;;  %v2586_v31 = vpop.f32.mrf.mxu1 }
 0x24c   : > { %v1522_v34 = vpop.f32.mrf.mxu0 }
 0x24d   : > { %2760 = vpow2.f32 %v2410_v41  ;;  %v2408_v35 = vmul.f32 -1.442695, %v3294_v26  ;;  %v3298_v37 = vadd.f32 %v3279_v16, %v1531_v33  ;;  %v1523_v39 = vadd.f32 %v1522_v34, %v1287_v23 }
 0x24e   : > { %v2619_v40 = vpop.f32.mrf.mxu0 }
 0x24f   : > { %2762 = vpow2.f32 %v2408_v35  ;;  %v2413_v42 = vmul.f32 -1.442695, %v3298_v37  ;;  %v3302_v44 = vadd.f32 %v3279_v16, %v1523_v39  ;;  %v1534_v0 = vadd.f32 %v2619_v40, %v2579_v32 }
 0x250   : > { %v1525_v45 = vpop.f32.mrf.mxu0 }
 0x251   : > { %2764 = vpow2.f32 %v2413_v42  ;;  %v2411_v36 = vmul.f32 -1.442695, %v3302_v44  ;;  %v3306_v47 = vadd.f32 %v3279_v16, %v1534_v0  ;;  %v1526_v49 = vadd.f32 %v1525_v45, %v1290_v7  ;;  %v1319_v42 = vpop.f32.mrf.mxu1 }
 0x253   : > { %2766 = vpow2.f32 %v2411_v36  ;;  %v2414_v50 = vmul.f32 -1.442695, %v3306_v47  ;;  %v3310_v52 = vadd.f32 %v3279_v16, %v1526_v49 }
 0x255   : > { %2768 = vpow2.f32 %v2414_v50  ;;  %v2412_v51 = vmul.f32 -1.442695, %v3310_v52 }
 0x256   : > { %v2757_v53 = vpop.eup %2756 }
 0x257   : > { %2770 = vpow2.f32 %v2412_v51  ;;  %v1770_v58 = vadd.f32 1.0, %v2757_v53  ;;  %v2587_v51 = vpop.f32.mrf.mxu1 }
 0x258   : > { %v2759_v55 = vpop.eup %2758 }
 0x259   : > { %v1768_v56 = vadd.f32 1.0, %v2759_v55 }
 0x25a   : > { %v2761_v57 = vpop.eup %2760 }
 0x25b   : > { %v1771_v59 = vadd.f32 1.0, %v2761_v57  ;;  %v2622_v60 = vpop.f32.mrf.mxu0  ;;  %2772 = vrcp.f32 %v1768_v56 }
 0x25c   : > { %v2763_v62 = vpop.eup %2762  ;;  %v1547_v63 = vadd.f32 %v2622_v60, %v2582_v48 }
 0x25d   : > { %2774 = vrcp.f32 %v1771_v59  ;;  %v1769_v1 = vadd.f32 1.0, %v2763_v62  ;;  %v1538_v43 = vpop.f32.mrf.mxu0 }
 0x25e   : > { %v2765_v2 = vpop.eup %2764  ;;  %2776 = vrcp.f32 %v1770_v58  ;;  %v3314_v3 = vadd.f32 %v3279_v16, %v1547_v63  ;;  %v1539_v4 = vadd.f32 %v1538_v43, %v1303_v54  ;;  %v1322_v43 = vpop.f32.mrf.mxu1 }
 0x25f   : > { %2778 = vrcp.f32 %v1769_v1  ;;  %v1774_v5 = vadd.f32 1.0, %v2765_v2  ;;  %v2623_v6 = vpop.f32.mrf.mxu0 }
 0x260   : > { %v2767_v9 = vpop.eup %2766  ;;  %v2417_v10 = vmul.f32 -1.442695, %v3314_v3  ;;  %v3318_v11 = vadd.f32 %v3279_v16, %v1539_v4  ;;  %v1550_v12 = vadd.f32 %v2623_v6, %v2583_v61 }
 0x261   : > { %2780 = vrcp.f32 %v1774_v5  ;;  %v1772_v13 = vadd.f32 1.0, %v2767_v9  ;;  %v1541_v14 = vpop.f32.mrf.mxu0 }
 0x262   : > { %v2769_v38 = vpop.eup %2768  ;;  %2782 = vpow2.f32 %v2417_v10  ;;  %v2415_v15 = vmul.f32 -1.442695, %v3318_v11  ;;  %v3322_v17 = vadd.f32 %v3279_v16, %v1550_v12  ;;  %v1542_v18 = vadd.f32 %v1541_v14, %v1306_v8  ;;  %v2590_v14 = vpop.f32.mrf.mxu1 }
 0x263   : > { %2784 = vrcp.f32 %v1772_v13  ;;  %v1775_v19 = vadd.f32 1.0, %v2769_v38 }
 0x264   : > { %v2771_v21 = vpop.eup %2770  ;;  %2786 = vpow2.f32 %v2415_v15  ;;  %v2418_v22 = vmul.f32 -1.442695, %v3322_v17  ;;  %v3326_v23 = vadd.f32 %v3279_v16, %v1542_v18 }
 0x265   : > { %2788 = vrcp.f32 %v1775_v19  ;;  %v1773_v46 = vadd.f32 1.0, %v2771_v21 }
 0x266   : > { %2790 = vpow2.f32 %v2418_v22  ;;  %v2416_v25 = vmul.f32 -1.442695, %v3326_v23 }
 0x267   : > { %2792 = vrcp.f32 %v1773_v46  ;;  %v1335_v46 = vpop.f32.mrf.mxu1 }
 0x268   : > { %2794 = vpow2.f32 %v2416_v25  ;;  %v2773_v27 = vpop.eup %2772 }
 0x269   : > { %v1864_v33 = vmul.f32 %v2773_v27, %v3286_v24 }
 0x26a   : > { %v2775_v28 = vpop.eup %2774 }
 0x26b   : > { %v2777_v30 = vpop.eup %2776  ;;  %v1867_v41 = vmul.f32 %v2775_v28, %v3290_v29 }
 0x26c   : > { %v2779_v32 = vpop.eup %2778  ;;  %v1866_v39 = vmul.f32 %v2777_v30, %v3282_v20 }
 0x26d   : > { %v1865_v34 = vmul.f32 %v2779_v32, %v3294_v26 }
 0x26e   : > { %v2781_v35 = vpop.eup %2780  ;;  %v1897_v45 = vpack.c.bf16 %v1867_v41, %v1866_v39 }
 0x26f   : > { %v2783_v40 = vpop.eup %2782  ;;  %v1896_v7 = vpack.c.bf16 %v1865_v34, %v1864_v33  ;;  %v1870_v56 = vmul.f32 %v2781_v35, %v3298_v37 }
 0x270   : > { %v2785_v0 = vpop.eup %2784  ;;  %v1778_v26 = vadd.f32 1.0, %v2783_v40 }
 0x271   : > { %v2787_v36 = vpop.eup %2786  ;;  %2652 = vmatprep.mubr.msk.bf16.mxu1 %vm1951_vm13, %v1896_v7  ;;  %v1868_v57 = vmul.f32 %v2785_v0, %v3302_v44 }
 0x272   : > { %v2789_v49 = vpop.eup %2788  ;;  %v1776_v50 = vadd.f32 1.0, %v2787_v36  ;;  %2653 = vmatmul.mubr.msk.bf16.vlgmr.msra.gmra.mxu1 %vm1951_vm13, %v1897_v45 }
 0x273   : > { %v2791_v29 = vpop.eup %2790  ;;  %v1871_v24 = vmul.f32 %v2789_v49, %v3306_v47  ;;  %v2626_v48 = vpop.f32.mrf.mxu0 }
 0x274   : > { %v2793_v20 = vpop.eup %2792  ;;  %v1779_v53 = vadd.f32 1.0, %v2791_v29  ;;  %v1563_v54 = vadd.f32 %v2626_v48, %v2586_v31  ;;  %2796 = vrcp.f32 %v1776_v50 }
 0x275   : > { %v2795_v55 = vpop.eup %2794  ;;  %v1869_v58 = vmul.f32 %v2793_v20, %v3310_v52  ;;  %v1554_v59 = vpop.f32.mrf.mxu0  ;;  %v1899_v62 = vpack.c.bf16 %v1871_v24, %v1870_v56 }
 0x276   : > { %2798 = vrcp.f32 %v1779_v53  ;;  %v1777_v60 = vadd.f32 1.0, %v2795_v55  ;;  %v3340_v61 = vadd.f32 %v3279_v16, %v1563_v54  ;;  %v1555_v47 = vadd.f32 %v1554_v59, %v1319_v42 }
 0x277   : > { %v1898_v63 = vpack.c.bf16 %v1869_v58, %v1868_v57  ;;  %2800 = vrcp.f32 %v1778_v26  ;;  %v2627_v1 = vpop.f32.mrf.mxu0 }
 0x278   : > { %2802 = vrcp.f32 %v1777_v60  ;;  %v2421_v37 = vmul.f32 -1.442695, %v3340_v61  ;;  %v3344_v44 = vadd.f32 %v3279_v16, %v1555_v47  ;;  %v1566_v52 = vadd.f32 %v2627_v1, %v2587_v51 }
 0x279   : > { %v1557_v2 = vpop.f32.mrf.mxu0  ;;  %2656 = vmatprep.mubr.msk.bf16.mxu1 %vm1951_vm13, %v1898_v63 }
 0x27a   : > { %v2419_v4 = vmul.f32 -1.442695, %v3344_v44  ;;  %v3349_v5 = vadd.f32 %v3279_v16, %v1566_v52  ;;  %v1558_v6 = vadd.f32 %v1557_v2, %v1322_v43  ;;  %2657 = vmatmul.mubr.msk.bf16.gmra.mxu1 %vm1951_vm13, %v1899_v62  ;;  %2804 = vpow2.f32 %v2421_v37 }
 0x27c   : > { %2806 = vpow2.f32 %v2419_v4  ;;  %v2422_v8 = vmul.f32 -1.442695, %v3349_v5  ;;  %v1653_v9 = vadd.f32 %v3279_v16, %v1558_v6 }
 0x27e   : > { %2808 = vpow2.f32 %v2422_v8  ;;  %v2420_v10 = vmul.f32 -1.442695, %v1653_v9 }
 0x280   : > { %2810 = vpow2.f32 %v2420_v10 }
 0x281   : > { %v2797_v12 = vpop.eup %2796 }
 0x282   : > { %v1872_v19 = vmul.f32 %v2797_v12, %v3318_v11 }
 0x283   : > { %v2799_v13 = vpop.eup %2798 }
 0x284   : > { %v2801_v38 = vpop.eup %2800  ;;  %v1875_v18 = vmul.f32 %v2799_v13, %v3322_v17  ;;  %v2591_v17 = vpop.f32.mrf.mxu1 }
 0x285   : > { %v2803_v15 = vpop.eup %2802  ;;  %v1874_v22 = vmul.f32 %v2801_v38, %v3314_v3 }
 0x286   : > { %v1873_v21 = vmul.f32 %v2803_v15, %v3326_v23  ;;  %v1338_v42 = vpop.f32.mrf.mxu1 }
 0x287   : > { %v2805_v25 = vpop.eup %2804  ;;  %v1901_v30 = vpack.c.bf16 %v1875_v18, %v1874_v22 }
 0x288   : > { %v1900_v27 = vpack.c.bf16 %v1873_v21, %v1872_v19  ;;  %v1782_v41 = vadd.f32 1.0, %v2805_v25  ;;  %v2594_v54 = vpop.f32.mrf.mxu1 }
 0x289   : > { %v2807_v28 = vpop.eup %2806 }
 0x28a   : > { %v1780_v31 = vadd.f32 1.0, %v2807_v28  ;;  %2660 = vmatprep.mubr.msk.bf16.mxu1 %vm1951_vm13, %v1900_v27  ;;  %v1351_v47 = vpop.f32.mrf.mxu1 }
 0x28b   : > { %v2809_v32 = vpop.eup %2808  ;;  %v2630_v33 = vpop.f32.mrf.mxu0  ;;  %2661 = vmatmul.mubr.msk.bf16.gmra.mxu1 %vm1951_vm13, %v1901_v30 }
 0x28c   : > { %v1783_v34 = vadd.f32 1.0, %v2809_v32  ;;  %v1579_v11 = vadd.f32 %v2630_v33, %v2590_v14  ;;  %2812 = vrcp.f32 %v1780_v31  ;;  %v2595_v6 = vpop.f32.mrf.mxu1 }
 0x28d   : > { %v2811_v35 = vpop.eup %2810  ;;  %v1570_v23 = vpop.f32.mrf.mxu0 }
 0x28e   : > { %2814 = vrcp.f32 %v1783_v34  ;;  %v1781_v3 = vadd.f32 1.0, %v2811_v35  ;;  %v3361_v39 = vadd.f32 %v3279_v16, %v1579_v11  ;;  %v1571_v40 = vadd.f32 %v1570_v23, %v1335_v46  ;;  %v1354_v14 = vpop.f32.mrf.mxu1 }
 0x28f   : > { %2816 = vrcp.f32 %v1782_v41  ;;  %v2631_v7 = vpop.f32.mrf.mxu0 }
 0x290   : > { %2818 = vrcp.f32 %v1781_v3  ;;  %v2425_v0 = vmul.f32 -1.442695, %v3361_v39  ;;  %v3365_v45 = vadd.f32 %v3279_v16, %v1571_v40  ;;  %v1582_v36 = vadd.f32 %v2631_v7, %v2591_v17  ;;  %v2598_v32 = vpop.f32.mrf.mxu1 }
 0x291   : > { %v1573_v49 = vpop.f32.mrf.mxu0 }
 0x292   : > { %v2423_v50 = vmul.f32 -1.442695, %v3365_v45  ;;  %v1659_v29 = vadd.f32 %v3279_v16, %v1582_v36  ;;  %v1574_v24 = vadd.f32 %v1573_v49, %v1338_v42  ;;  %2820 = vpow2.f32 %v2425_v0  ;;  %v1367_v23 = vpop.f32.mrf.mxu1 }
 0x294   : > { %2822 = vpow2.f32 %v2423_v50  ;;  %v2426_v26 = vmul.f32 -1.442695, %v1659_v29  ;;  %v1657_v48 = vadd.f32 %v3279_v16, %v1574_v24  ;;  %v2599_v24 = vpop.f32.mrf.mxu1 }
 0x296   : > { %2824 = vpow2.f32 %v2426_v26  ;;  %v2424_v51 = vmul.f32 -1.442695, %v1657_v48 }
 0x298   : > { %2826 = vpow2.f32 %v2424_v51 }
 0x299   : > { %v2813_v20 = vpop.eup %2812 }
 0x29a   : > { %v1876_v58 = vmul.f32 %v2813_v20, %v3344_v44 }
 0x29b   : > { %v2815_v53 = vpop.eup %2814 }
 0x29c   : > { %v2817_v55 = vpop.eup %2816  ;;  %v1879_v57 = vmul.f32 %v2815_v53, %v3349_v5 }
 0x29d   : > { %v2819_v56 = vpop.eup %2818  ;;  %v1878_v60 = vmul.f32 %v2817_v55, %v3340_v61 }
 0x29e   : > { %v1877_v59 = vmul.f32 %v2819_v56, %v1653_v9 }
 0x29f   : > { %v2821_v62 = vpop.eup %2820  ;;  %v1903_v43 = vpack.c.bf16 %v1879_v57, %v1878_v60 }
 0x2a0   : > { %v1902_v63 = vpack.c.bf16 %v1877_v59, %v1876_v58  ;;  %v1786_v2 = vadd.f32 1.0, %v2821_v62 }
 0x2a1   : > { %v2823_v1 = vpop.eup %2822 }
 0x2a2   : > { %v1784_v37 = vadd.f32 1.0, %v2823_v1  ;;  %2664 = vmatprep.mubr.msk.bf16.mxu1 %vm1951_vm13, %v1902_v63 }
 0x2a3   : > { %v2825_v52 = vpop.eup %2824  ;;  %v2634_v4 = vpop.f32.mrf.mxu0  ;;  %2665 = vmatmul.mubr.msk.bf16.gmra.mxu1 %vm1951_vm13, %v1903_v43 }
 0x2a4   : > { %v1787_v5 = vadd.f32 1.0, %v2825_v52  ;;  %v1595_v8 = vadd.f32 %v2634_v4, %v2594_v54  ;;  %2828 = vrcp.f32 %v1784_v37  ;;  %v1370_v54 = vpop.f32.mrf.mxu1 }
 0x2a5   : > { %v2827_v44 = vpop.eup %2826  ;;  %v1586_v9 = vpop.f32.mrf.mxu0 }
 0x2a6   : > { %2830 = vrcp.f32 %v1787_v5  ;;  %v1785_v61 = vadd.f32 1.0, %v2827_v44  ;;  %v3376_v10 = vadd.f32 %v3279_v16, %v1595_v8  ;;  %v1587_v12 = vadd.f32 %v1586_v9, %v1351_v47 }
 0x2a7   : > { %2832 = vrcp.f32 %v1786_v2  ;;  %v2635_v13 = vpop.f32.mrf.mxu0 }
 0x2a8   : > { %2834 = vrcp.f32 %v1785_v61  ;;  %v2429_v38 = vmul.f32 -1.442695, %v3376_v10  ;;  %v3380_v15 = vadd.f32 %v3279_v16, %v1587_v12  ;;  %v1598_v18 = vadd.f32 %v2635_v13, %v2595_v6  ;;  %v2602_v6 = vpop.f32.mrf.mxu1 }
 0x2a9   : > { %v1589_v19 = vpop.f32.mrf.mxu0 }
 0x2aa   : > { %v2427_v21 = vmul.f32 -1.442695, %v3380_v15  ;;  %v1663_v22 = vadd.f32 %v3279_v16, %v1598_v18  ;;  %v1590_v46 = vadd.f32 %v1589_v19, %v1354_v14  ;;  %2836 = vpow2.f32 %v2429_v38  ;;  %v1383_v14 = vpop.f32.mrf.mxu1 }
 0x2ac   : > { %2838 = vpow2.f32 %v2427_v21  ;;  %v2430_v25 = vmul.f32 -1.442695, %v1663_v22  ;;  %v1661_v27 = vadd.f32 %v3279_v16, %v1590_v46 }
 0x2ae   : > { %2840 = vpow2.f32 %v2430_v25  ;;  %v2428_v28 = vmul.f32 -1.442695, %v1661_v27 }
 0x2b0   : > { %2842 = vpow2.f32 %v2428_v28 }
 0x2b1   : > { %v2829_v30 = vpop.eup %2828 }
 0x2b2   : > { %v1880_v34 = vmul.f32 %v2829_v30, %v3365_v45 }
 0x2b3   : > { %v2831_v31 = vpop.eup %2830 }
 0x2b4   : > { %v2833_v41 = vpop.eup %2832  ;;  %v1883_v17 = vmul.f32 %v2831_v31, %v1659_v29 }
 0x2b5   : > { %v2835_v33 = vpop.eup %2834  ;;  %v1882_v35 = vmul.f32 %v2833_v41, %v3361_v39 }
 0x2b6   : > { %v1881_v11 = vmul.f32 %v2835_v33, %v1657_v48 }
 0x2b7   : > { %v2837_v3 = vpop.eup %2836  ;;  %v1905_v42 = vpack.c.bf16 %v1883_v17, %v1882_v35 }
 0x2b8   : > { %v1904_v40 = vpack.c.bf16 %v1881_v11, %v1880_v34  ;;  %v1790_v49 = vadd.f32 1.0, %v2837_v3 }
 0x2b9   : > { %v2839_v7 = vpop.eup %2838 }
 0x2ba   : > { %v1788_v0 = vadd.f32 1.0, %v2839_v7  ;;  %2668 = vmatprep.mubr.msk.bf16.mxu1 %vm1951_vm13, %v1904_v40 }
 0x2bb   : > { %v2841_v36 = vpop.eup %2840  ;;  %v2638_v50 = vpop.f32.mrf.mxu0  ;;  %2669 = vmatmul.mubr.msk.bf16.gmra.mxu1 %vm1951_vm13, %v1905_v42 }
 0x2bc   : > { %v1791_v29 = vadd.f32 1.0, %v2841_v36  ;;  %v1611_v26 = vadd.f32 %v2638_v50, %v2598_v32  ;;  %2844 = vrcp.f32 %v1788_v0 }
 0x2bd   : > { %v2843_v45 = vpop.eup %2842  ;;  %v1602_v48 = vpop.f32.mrf.mxu0 }
 0x2be   : > { %2846 = vrcp.f32 %v1791_v29  ;;  %v1789_v39 = vadd.f32 1.0, %v2843_v45  ;;  %v3390_v51 = vadd.f32 %v3279_v16, %v1611_v26  ;;  %v1603_v20 = vadd.f32 %v1602_v48, %v1367_v23 }
 0x2bf   : > { %2848 = vrcp.f32 %v1790_v49  ;;  %v2639_v53 = vpop.f32.mrf.mxu0 }
 0x2c0   : > { %2850 = vrcp.f32 %v1789_v39  ;;  %v2433_v55 = vmul.f32 -1.442695, %v3390_v51  ;;  %v3394_v56 = vadd.f32 %v3279_v16, %v1603_v20  ;;  %v1614_v57 = vadd.f32 %v2639_v53, %v2599_v24 }
 0x2c1   : > { %v1605_v58 = vpop.f32.mrf.mxu0 }
 0x2c2   : > { %v2431_v59 = vmul.f32 -1.442695, %v3394_v56  ;;  %v1667_v60 = vadd.f32 %v3279_v16, %v1614_v57  ;;  %v1606_v47 = vadd.f32 %v1605_v58, %v1370_v54  ;;  %2852 = vpow2.f32 %v2433_v55 }
 0x2c4   : > { %2854 = vpow2.f32 %v2431_v59  ;;  %v2434_v62 = vmul.f32 -1.442695, %v1667_v60  ;;  %v1665_v63 = vadd.f32 %v3279_v16, %v1606_v47 }
 0x2c6   : > { %2856 = vpow2.f32 %v2434_v62  ;;  %v2432_v1 = vmul.f32 -1.442695, %v1665_v63 }
 0x2c8   : > { %2858 = vpow2.f32 %v2432_v1 }
 0x2c9   : > { %v2845_v43 = vpop.eup %2844 }
 0x2ca   : > { %v1884_v5 = vmul.f32 %v2845_v43, %v3380_v15  ;;  %v2603_v15 = vpop.f32.mrf.mxu1 }
 0x2cb   : > { %v2847_v37 = vpop.eup %2846 }
 0x2cc   : > { %v2849_v52 = vpop.eup %2848  ;;  %v1887_v4 = vmul.f32 %v2847_v37, %v1663_v22  ;;  %v1386_v17 = vpop.f32.mrf.mxu1 }
 0x2cd   : > { %v2851_v2 = vpop.eup %2850  ;;  %v1886_v44 = vmul.f32 %v2849_v52, %v3376_v10  ;;  %v3416_v52 = vld [vmem:[%s3531_s7] ss:$0 sm:$0xff] }
 0x2ce   : > { %v1885_v8 = vmul.f32 %v2851_v2, %v1661_v27 }
 0x2cf   : > { %v2853_v9 = vpop.eup %2852  ;;  %v1907_v13 = vpack.c.bf16 %v1887_v4, %v1886_v44 }
 0x2d0   : > { %v1906_v61 = vpack.c.bf16 %v1885_v8, %v1884_v5  ;;  %v1794_v19 = vadd.f32 1.0, %v2853_v9 }
 0x2d1   : > { %v2855_v12 = vpop.eup %2854 }
 0x2d2   : > { %v1792_v38 = vadd.f32 1.0, %v2855_v12  ;;  %2672 = vmatprep.mubr.msk.bf16.mxu1 %vm1951_vm13, %v1906_v61 }
 0x2d3   : > { %v2857_v18 = vpop.eup %2856  ;;  %v2642_v21 = vpop.f32.mrf.mxu0  ;;  %2673 = vmatmul.mubr.msk.bf16.gmra.mxu1 %vm1951_vm13, %v1907_v13 }
 0x2d4   : > { %v1795_v22 = vadd.f32 1.0, %v2857_v18  ;;  %v1627_v46 = vadd.f32 %v2642_v21, %v2602_v6  ;;  %2860 = vrcp.f32 %v1792_v38 }
 0x2d5   : > { %v2859_v25 = vpop.eup %2858  ;;  %v1618_v27 = vpop.f32.mrf.mxu0 }
 0x2d6   : > { %2862 = vrcp.f32 %v1795_v22  ;;  %v1793_v10 = vadd.f32 1.0, %v2859_v25  ;;  %v1670_v28 = vadd.f32 %v3279_v16, %v1627_v46  ;;  %v1619_v30 = vadd.f32 %v1618_v27, %v1383_v14 }
 0x2d7   : > { %2864 = vrcp.f32 %v1794_v19  ;;  %v2643_v31 = vpop.f32.mrf.mxu0 }
 0x2d8   : > { %2866 = vrcp.f32 %v1793_v10  ;;  %v2437_v32 = vmul.f32 -1.442695, %v1670_v28  ;;  %v1668_v41 = vadd.f32 %v3279_v16, %v1619_v30  ;;  %v1630_v33 = vadd.f32 %v2643_v31, %v2603_v15 }
 0x2d9   : > { %v1621_v34 = vpop.f32.mrf.mxu0 }
 0x2da   : > { %v2435_v11 = vmul.f32 -1.442695, %v1668_v41  ;;  %v1671_v35 = vadd.f32 %v3279_v16, %v1630_v33  ;;  %v1622_v23 = vadd.f32 %v1621_v34, %v1386_v17  ;;  %2868 = vpow2.f32 %v2437_v32 }
 0x2dc   : > { %2870 = vpow2.f32 %v2435_v11  ;;  %v2438_v3 = vmul.f32 -1.442695, %v1671_v35  ;;  %v1669_v40 = vadd.f32 %v3279_v16, %v1622_v23 }
 0x2de   : > { %2872 = vpow2.f32 %v2438_v3  ;;  %v2436_v7 = vmul.f32 -1.442695, %v1669_v40 }
 0x2e0   : > { %2874 = vpow2.f32 %v2436_v7 }
 0x2e1   : > { %v2861_v42 = vpop.eup %2860 }
 0x2e2   : > { %v1888_v24 = vmul.f32 %v2861_v42, %v3394_v56 }
 0x2e3   : > { %v2863_v0 = vpop.eup %2862 }
 0x2e4   : > { %v2865_v36 = vpop.eup %2864  ;;  %v1891_v50 = vmul.f32 %v2863_v0, %v1667_v60 }
 0x2e5   : > { %v2867_v49 = vpop.eup %2866  ;;  %v1890_v26 = vmul.f32 %v2865_v36, %v3390_v51 }
 0x2e6   : > { %v1889_v29 = vmul.f32 %v2867_v49, %v1665_v63 }
 0x2e7   : > { %v2869_v45 = vpop.eup %2868  ;;  %v1909_v20 = vpack.c.bf16 %v1891_v50, %v1890_v26 }
 0x2e8   : > { %v1908_v48 = vpack.c.bf16 %v1889_v29, %v1888_v24  ;;  %v1798_v54 = vadd.f32 1.0, %v2869_v45 }
 0x2e9   : > { %v2871_v39 = vpop.eup %2870 }
 0x2ea   : > { %v1796_v53 = vadd.f32 1.0, %v2871_v39  ;;  %2676 = vmatprep.mubr.msk.bf16.mxu1 %vm1951_vm13, %v1908_v48 }
 0x2eb   : > { %v2873_v16 = vpop.eup %2872  ;;  %2677 = vmatmul.mubr.msk.bf16.gmra.mxu1 %vm1951_vm13, %v1909_v20 }
 0x2ec   : > { %v1799_v55 = vadd.f32 1.0, %v2873_v16  ;;  %2876 = vrcp.f32 %v1796_v53 }
 0x2ed   : > { %v2875_v57 = vpop.eup %2874 }
 0x2ee   : > { %2878 = vrcp.f32 %v1799_v55  ;;  %v1797_v58 = vadd.f32 1.0, %v2875_v57 }
 0x2ef   : > { %2880 = vrcp.f32 %v1798_v54 }
 0x2f0   : > { %2882 = vrcp.f32 %v1797_v58 }
 0x2f9   : > { %v2877_v51 = vpop.eup %2876 }
 0x2fa   : > { %v1892_v62 = vmul.f32 %v2877_v51, %v1668_v41 }
 0x2fb   : > { %v2879_v56 = vpop.eup %2878 }
 0x2fc   : > { %v2881_v59 = vpop.eup %2880  ;;  %v1895_v47 = vmul.f32 %v2879_v56, %v1671_v35 }
 0x2fd   : > { %v2883_v60 = vpop.eup %2882  ;;  %v1894_v1 = vmul.f32 %v2881_v59, %v1670_v28 }
 0x2fe   : > { %v1893_v63 = vmul.f32 %v2883_v60, %v1669_v40 }
 0x2ff   : > { %v1911_v37 = vpack.c.bf16 %v1895_v47, %v1894_v1 }
 0x300   : > { %v1910_v43 = vpack.c.bf16 %v1893_v63, %v1892_v62 }
 0x302   : > { %2680 = vmatprep.mubr.msk.bf16.mxu1 %vm1951_vm13, %v1910_v43 }
 0x303   : > { %2681 = vmatmul.mubr.msk.bf16.gmra.mxu1 %vm1951_vm13, %v1911_v37 }
 0x332   : > { %v2654_v2 = vpop.f32.mrf.mxu1 }
 0x333   : > { %v2043_v4 = vadd.f32 %v2654_v2, %v3416_v52 }
 0x334   : > { %v2034_v6 = vpop.f32.mrf.mxu1 }
 0x335   : > { %2164 = vst.msk [vmem:[%s3423_s23 + $0x10] sm:$0xff] %vm2161_vm9, %v2043_v4  ;;  %v2035_v5 = vadd.f32 %v3416_v52, %v2034_v6 }
 0x336   : > { %v2655_v8 = vpop.f32.mrf.mxu1 }
 0x337   : > { %2162 = vst.msk [vmem:[%s3423_s23] sm:$0xff] %vm2161_vm9, %v2035_v5  ;;  %v2046_v44 = vadd.f32 %v2655_v8, %v3416_v52 }
 0x338   : > { %v2037_v9 = vpop.f32.mrf.mxu1 }
 0x339   : > { %2165 = vst.msk [vmem:[%s3423_s23 + $0x18] sm:$0xff] %vm2161_vm9, %v2046_v44  ;;  %v2038_v61 = vadd.f32 %v3416_v52, %v2037_v9 }
 0x33a   : > { %v2658_v12 = vpop.f32.mrf.mxu1 }
 0x33b   : > { %2163 = vst.msk [vmem:[%s3423_s23 + $0x8] sm:$0xff] %vm2161_vm9, %v2038_v61  ;;  %v2059_v13 = vadd.f32 %v2658_v12, %v3416_v52 }
 0x33c   : > { %v2050_v14 = vpop.f32.mrf.mxu1 }
 0x33d   : > { %2168 = vst.msk [vmem:[%s3423_s23 + $0x30] sm:$0xff] %vm2161_vm9, %v2059_v13  ;;  %v2051_v38 = vadd.f32 %v3416_v52, %v2050_v14 }
 0x33e   : > { %v2659_v18 = vpop.f32.mrf.mxu1 }
 0x33f   : > { %2166 = vst.msk [vmem:[%s3423_s23 + $0x20] sm:$0xff] %vm2161_vm9, %v2051_v38  ;;  %v2062_v19 = vadd.f32 %v2659_v18, %v3416_v52 }
 0x340   : > { %v2053_v21 = vpop.f32.mrf.mxu1 }
 0x341   : > { %2169 = vst.msk [vmem:[%s3423_s23 + $0x38] sm:$0xff] %vm2161_vm9, %v2062_v19  ;;  %v2054_v22 = vadd.f32 %v3416_v52, %v2053_v21 }
 0x343   : > { %2167 = vst.msk [vmem:[%s3423_s23 + $0x28] sm:$0xff] %vm2161_vm9, %v2054_v22 }
 0x34b   : > { %v2662_v46 = vpop.f32.mrf.mxu1 }
 0x34c   : > { %v2075_v25 = vadd.f32 %v2662_v46, %v3416_v52 }
 0x34d   : > { %v2066_v15 = vpop.f32.mrf.mxu1 }
 0x34e   : > { %2172 = vst.msk [vmem:[%s3423_s23 + $0x50] sm:$0xff] %vm2161_vm9, %v2075_v25  ;;  %v2067_v27 = vadd.f32 %v3416_v52, %v2066_v15 }
 0x34f   : > { %v2663_v10 = vpop.f32.mrf.mxu1 }
 0x350   : > { %2170 = vst.msk [vmem:[%s3423_s23 + $0x40] sm:$0xff] %vm2161_vm9, %v2067_v27  ;;  %v2078_v28 = vadd.f32 %v2663_v10, %v3416_v52 }
 0x351   : > { %v2069_v30 = vpop.f32.mrf.mxu1 }
 0x352   : > { %2173 = vst.msk [vmem:[%s3423_s23 + $0x58] sm:$0xff] %vm2161_vm9, %v2078_v28  ;;  %v2070_v31 = vadd.f32 %v3416_v52, %v2069_v30 }
 0x354   : > { %2171 = vst.msk [vmem:[%s3423_s23 + $0x48] sm:$0xff] %vm2161_vm9, %v2070_v31 }
 0x363   : > { %v2666_v32 = vpop.f32.mrf.mxu1 }
 0x364   : > { %v2091_v41 = vadd.f32 %v2666_v32, %v3416_v52 }
 0x365   : > { %v2082_v33 = vpop.f32.mrf.mxu1 }
 0x366   : > { %2176 = vst.msk [vmem:[%s3423_s23 + $0x70] sm:$0xff] %vm2161_vm9, %v2091_v41  ;;  %v2083_v17 = vadd.f32 %v3416_v52, %v2082_v33 }
 0x367   : > { %v2667_v34 = vpop.f32.mrf.mxu1 }
 0x368   : > { %2174 = vst.msk [vmem:[%s3423_s23 + $0x60] sm:$0xff] %vm2161_vm9, %v2083_v17  ;;  %v2094_v11 = vadd.f32 %v2667_v34, %v3416_v52 }
 0x369   : > { %v2085_v35 = vpop.f32.mrf.mxu1 }
 0x36a   : > { %2177 = vst.msk [vmem:[%s3423_s23 + $0x78] sm:$0xff] %vm2161_vm9, %v2094_v11  ;;  %v2086_v23 = vadd.f32 %v3416_v52, %v2085_v35 }
 0x36c   : > { %2175 = vst.msk [vmem:[%s3423_s23 + $0x68] sm:$0xff] %vm2161_vm9, %v2086_v23 }
 0x37b   : > { %v2670_v3 = vpop.f32.mrf.mxu1 }
 0x37c   : > { %v2107_v40 = vadd.f32 %v2670_v3, %v3416_v52 }
 0x37d   : > { %v2098_v7 = vpop.f32.mrf.mxu1 }
 0x37e   : > { %2180 = vst.msk [vmem:[%s3423_s23 + $0x90] sm:$0xff] %vm2161_vm9, %v2107_v40  ;;  %v2099_v42 = vadd.f32 %v3416_v52, %v2098_v7 }
 0x37f   : > { %v2671_v0 = vpop.f32.mrf.mxu1 }
 0x380   : > { %2178 = vst.msk [vmem:[%s3423_s23 + $0x80] sm:$0xff] %vm2161_vm9, %v2099_v42  ;;  %v2110_v36 = vadd.f32 %v2671_v0, %v3416_v52 }
 0x381   : > { %v2101_v49 = vpop.f32.mrf.mxu1 }
 0x382   : > { %2181 = vst.msk [vmem:[%s3423_s23 + $0x98] sm:$0xff] %vm2161_vm9, %v2110_v36  ;;  %v2102_v50 = vadd.f32 %v3416_v52, %v2101_v49 }
 0x384   : > { %2179 = vst.msk [vmem:[%s3423_s23 + $0x88] sm:$0xff] %vm2161_vm9, %v2102_v50 }
 0x393   : > { %v2674_v24 = vpop.f32.mrf.mxu1 }
 0x394   : > { %v2123_v29 = vadd.f32 %v2674_v24, %v3416_v52 }
 0x395   : > { %v2114_v26 = vpop.f32.mrf.mxu1 }
 0x396   : > { %2184 = vst.msk [vmem:[%s3423_s23 + $0xb0] sm:$0xff] %vm2161_vm9, %v2123_v29  ;;  %v2115_v45 = vadd.f32 %v3416_v52, %v2114_v26 }
 0x397   : > { %v2675_v48 = vpop.f32.mrf.mxu1 }
 0x398   : > { %2182 = vst.msk [vmem:[%s3423_s23 + $0xa0] sm:$0xff] %vm2161_vm9, %v2115_v45  ;;  %v2126_v39 = vadd.f32 %v2675_v48, %v3416_v52 }
 0x399   : > { %v2117_v20 = vpop.f32.mrf.mxu1 }
 0x39a   : > { %2185 = vst.msk [vmem:[%s3423_s23 + $0xb8] sm:$0xff] %vm2161_vm9, %v2126_v39  ;;  %v2118_v53 = vadd.f32 %v3416_v52, %v2117_v20 }
 0x39c   : > { %2183 = vst.msk [vmem:[%s3423_s23 + $0xa8] sm:$0xff] %vm2161_vm9, %v2118_v53 }
 0x3ab   : > { %v2678_v16 = vpop.f32.mrf.mxu1 }
 0x3ac   : > { %v2139_v54 = vadd.f32 %v2678_v16, %v3416_v52 }
 0x3ad   : > { %v2130_v55 = vpop.f32.mrf.mxu1 }
 0x3ae   : > { %2188 = vst.msk [vmem:[%s3423_s23 + $0xd0] sm:$0xff] %vm2161_vm9, %v2139_v54  ;;  %v2131_v57 = vadd.f32 %v3416_v52, %v2130_v55 }
 0x3af   : > { %v2679_v58 = vpop.f32.mrf.mxu1 }
 0x3b0   : > { %2186 = vst.msk [vmem:[%s3423_s23 + $0xc0] sm:$0xff] %vm2161_vm9, %v2131_v57  ;;  %v2142_v51 = vadd.f32 %v2679_v58, %v3416_v52 }
 0x3b1   : > { %v2133_v56 = vpop.f32.mrf.mxu1 }
 0x3b2   : > { %2189 = vst.msk [vmem:[%s3423_s23 + $0xd8] sm:$0xff] %vm2161_vm9, %v2142_v51  ;;  %v2134_v59 = vadd.f32 %v3416_v52, %v2133_v56 }
 0x3b4   : > { %2187 = vst.msk [vmem:[%s3423_s23 + $0xc8] sm:$0xff] %vm2161_vm9, %v2134_v59 }
 0x3c3   : > { %v2682_v60 = vpop.f32.mrf.mxu1 }
 0x3c4   : > { %v2155_v47 = vadd.f32 %v2682_v60, %v3416_v52 }
 0x3c5   : > { %v2146_v62 = vpop.f32.mrf.mxu1 }
 0x3c6   : > { %2192 = vst.msk [vmem:[%s3423_s23 + $0xf0] sm:$0xff] %vm2161_vm9, %v2155_v47  ;;  %v2147_v63 = vadd.f32 %v3416_v52, %v2146_v62 }
 0x3c7   : > { %v2683_v1 = vpop.f32.mrf.mxu1 }
 0x3c8   : > { %2190 = vst.msk [vmem:[%s3423_s23 + $0xe0] sm:$0xff] %vm2161_vm9, %v2147_v63  ;;  %v2158_v43 = vadd.f32 %v2683_v1, %v3416_v52 }
 0x3c9   : > { %v2149_v37 = vpop.f32.mrf.mxu1 }
 0x3ca   : > { %2193 = vst.msk [vmem:[%s3423_s23 + $0xf8] sm:$0xff] %vm2161_vm9, %v2158_v43  ;;  %v2150_v2 = vadd.f32 %v3416_v52, %v2149_v37 }
 0x3cc   : > { %2191 = vst.msk [vmem:[%s3423_s23 + $0xe8] sm:$0xff] %vm2161_vm9, %v2150_v2 }
 0x3cd PF: > { %s18_s27 = sadd.s32 1, %s2890_s27  }
 0x3ce   : > { %p15_p4 = scmp.ge.s32.totalorder %s18_s27, 4  }
 0x3d0   :  { %17 = sbr.rel (!%p15_p4) target bundleno = 1 (0x1), region = 85 }

</bundles_post_ra>
